<compile_context>
chip_gen: v6e
topology: v6e:2x2x1
jax: 0.10.0
libtpu: 0.0.40
codegen_flags: <defaults>
</compile_context>

<pallas_src>
import functools

import jax
import jax.numpy as jnp
from jax.experimental import pallas as pl
from jax.experimental.pallas import tpu as pltpu

BN_EPS = 1e-5
EPS = 1e-8
F32 = jnp.float32


# ---------------------------------------------------------------------------
# In-kernel helpers
# ---------------------------------------------------------------------------
def _conv3_acc(pad_ref, x_val, w_ref, acc=None):
    """Conv1d(kernel=3, padding=1) over the length dim as 3 MXU matmuls.

    pad_ref : VMEM scratch (L+2, Cin) used to build the zero-padded input.
    x_val   : (L, Cin) value (the +1e-8 is already added where torch adds it).
    w_ref   : (3, Cin, Cout) with w_ref[k] == torch_weight[:, :, k].T
    Returns (L, Cout) f32 (optionally accumulated onto `acc`).
    """
    L, cin = x_val.shape
    zrow = jnp.zeros((1, cin), F32)
    pad_ref[pl.ds(0, 1), :] = zrow            # conv's own zero padding (exact 0)
    pad_ref[pl.ds(L + 1, 1), :] = zrow
    pad_ref[pl.ds(1, L), :] = x_val
    out = jnp.dot(pad_ref[pl.ds(0, L), :], w_ref[0], preferred_element_type=F32)
    if acc is not None:
        out = out + acc
    out = out + jnp.dot(x_val, w_ref[1], preferred_element_type=F32)
    out = out + jnp.dot(pad_ref[pl.ds(2, L), :], w_ref[2], preferred_element_type=F32)
    return out


def _bn_tanh(acc, sb_ref):
    """Folded (conv bias + eval BatchNorm) affine followed by tanh."""
    sb = sb_ref[...]                          # (2, Cout): row0 = scale, row1 = bias
    return jnp.tanh(acc * sb[0:1, :] + sb[1:2, :])


# ---------------------------------------------------------------------------
# Encoder kernel: all down blocks fused (conv->bn->tanh x2, fused MaxPool1d(2))
# ---------------------------------------------------------------------------
def _encoder_kernel(*refs, n_blocks):
    # refs = x, [w1, sb1, w2, sb2]*n, skip_0..skip_{n-1}, enc, [pad1, pad2]*n
    x_ref = refs[0]
    wrefs = refs[1:1 + 4 * n_blocks]
    skip_refs = refs[1 + 4 * n_blocks:1 + 5 * n_blocks]
    enc_ref = refs[1 + 5 * n_blocks]
    scr = refs[2 + 5 * n_blocks:]

    def pool2(buf, y):                        # fused nn.MaxPool1d(2)
        L = y.shape[0]
        buf[pl.ds(0, L), :] = y
        half = L // 2
        return jnp.maximum(buf[pl.ds(0, half, 2), :],   # rows 0,2,4,...
                           buf[pl.ds(1, half, 2), :])   # rows 1,3,5,...

    cur = x_ref[0]                            # (L, Cin)
    for k in range(n_blocks):
        w1, sb1, w2, sb2 = wrefs[4 * k:4 * k + 4]
        pad1, pad2 = scr[2 * k], scr[2 * k + 1]
        if k > 0:
            # torch: this block consumes maxpool(previous block's output)
            cur = pool2(scr[2 * k - 1], cur)
        y1 = _bn_tanh(_conv3_acc(pad1, cur + EPS, w1), sb1)   # conv1+bn1+tanh
        y2 = _bn_tanh(_conv3_acc(pad2, y1 + EPS, w2), sb2)    # conv2+bn2+tanh
        skip_refs[k][0] = y2
        cur = y2
    # final encoder output = maxpool(last skip)
    enc_ref[0] = pool2(scr[2 * n_blocks - 1], cur)


# ---------------------------------------------------------------------------
# Decoder kernel: all up blocks fused (2x linear upsample + split-K skip concat
#                 + conv->bn->tanh x2, mean-subtract on the last block)
# ---------------------------------------------------------------------------
def _decoder_kernel(*refs, n_blocks):
    # refs = x, skip_0..skip_{n-1} (consumption order),
    #        [w1x, w1s, sb1, w2, sb2]*n, out, [padc, padu, pads, padh]*n
    x_ref = refs[0]
    skip_refs = refs[1:1 + n_blocks]
    wrefs = refs[1 + n_blocks:1 + 6 * n_blocks]
    out_ref = refs[1 + 6 * n_blocks]
    scr = refs[2 + 6 * n_blocks:]

    cur = x_ref[0]                            # (Lx, Cx)
    for k in range(n_blocks):
        w1x, w1s, sb1, w2, sb2 = wrefs[5 * k:5 * k + 5]
        padc, padu, pads, padh = scr[4 * k:4 * k + 4]
        Lx, cx = cur.shape
        Lu = 2 * Lx

        # -- F.interpolate(scale_factor=2, mode='linear', align_corners=False) --
        padc[pl.ds(1, Lx), :] = cur
        padc[pl.ds(0, 1), :] = cur[0:1, :]              # edge clamp (left)
        padc[pl.ds(Lx + 1, 1), :] = cur[Lx - 1:Lx, :]   # edge clamp (right)
        xl = padc[pl.ds(0, Lx), :]                      # row i -> x[i-1] clamped
        xr = padc[pl.ds(2, Lx), :]                      # row i -> x[i+1] clamped
        even = 0.25 * xl + 0.75 * cur                   # upsample rows 2i
        odd = 0.75 * cur + 0.25 * xr                    # upsample rows 2i+1
        # interleave straight into conv1's zero-padded VMEM buffer; +1e-8 goes
        # on the conv input while the padding rows stay exact zeros (matching
        # Conv1d's internal padding which happens after the +1e-8 add)
        zrow = jnp.zeros((1, cx), F32)
        padu[pl.ds(0, 1), :] = zrow
        padu[pl.ds(Lu + 1, 1), :] = zrow
        padu[pl.ds(1, Lx, 2), :] = even + EPS           # rows 1,3,...,2Lx-1
        padu[pl.ds(2, Lx, 2), :] = odd + EPS            # rows 2,4,...,2Lx

        # -- conv1: split-K over [upsampled | skip] channels (no concat) --
        acc = jnp.dot(padu[pl.ds(0, Lu), :], w1x[0], preferred_element_type=F32)
        acc = acc + jnp.dot(padu[pl.ds(1, Lu), :], w1x[1], preferred_element_type=F32)
        acc = acc + jnp.dot(padu[pl.ds(2, Lu), :], w1x[2], preferred_element_type=F32)
        acc = _conv3_acc(pads, skip_refs[k][0] + EPS, w1s, acc)
        y1 = _bn_tanh(acc, sb1)

        # -- conv2 (+ mean-subtract over the length dim on the last block) --
        y2 = _bn_tanh(_conv3_acc(padh, y1 + EPS, w2), sb2)
        if k == n_blocks - 1:
            y2 = y2 - jnp.mean(y2, axis=0, keepdims=True)
        cur = y2
    out_ref[0] = cur


# ---------------------------------------------------------------------------
# pallas_call wrappers
# ---------------------------------------------------------------------------
def _compiler_params():
    return pltpu.CompilerParams(
        dimension_semantics=("parallel",),          # B axis -> v7x's 2 cores
        vmem_limit_bytes=32 * 1024 * 1024,
    )


def unet_encoder(params, x):
    """x: (B, L, Cin) f32 -> (enc, [skip_0, ..., skip_{n-1}])."""
    B, L, cin = x.shape
    blocks = params["down"]
    n = len(blocks)
    assert L % (2 ** n) == 0

    lengths = [L // (2 ** k) for k in range(n)]
    in_specs = [pl.BlockSpec((1, L, cin), lambda b: (b, 0, 0))]
    args = [x]
    out_shapes, out_specs, scratch = [], [], []
    for k, p in enumerate(blocks):
        ci, co = p["w1"].shape[1], p["w1"].shape[2]
        in_specs += [
            pl.BlockSpec((3, ci, co), lambda b: (0, 0, 0)),
            pl.BlockSpec((2, co), lambda b: (0, 0)),
            pl.BlockSpec((3, co, co), lambda b: (0, 0, 0)),
            pl.BlockSpec((2, co), lambda b: (0, 0)),
        ]
        args += [p["w1"], p["sb1"], p["w2"], p["sb2"]]
        out_shapes.append(jax.ShapeDtypeStruct((B, lengths[k], co), F32))
        out_specs.append(pl.BlockSpec((1, lengths[k], co), lambda b: (b, 0, 0)))
        scratch += [pltpu.VMEM((lengths[k] + 2, ci), F32),
                    pltpu.VMEM((lengths[k] + 2, co), F32)]
    co_last = blocks[-1]["w1"].shape[2]
    out_shapes.append(jax.ShapeDtypeStruct((B, lengths[-1] // 2, co_last), F32))
    out_specs.append(pl.BlockSpec((1, lengths[-1] // 2, co_last), lambda b: (b, 0, 0)))

    outs = pl.pallas_call(
        functools.partial(_encoder_kernel, n_blocks=n),
        grid=(B,),
        in_specs=in_specs,
        out_shape=tuple(out_shapes),
        out_specs=tuple(out_specs),
        scratch_shapes=scratch,
        compiler_params=_compiler_params(),
    )(*args)
    skips = list(outs[:n])
    enc = outs[n]
    return enc, skips


def unet_decoder(params, x, skips):
    """x: (B, Lx, Cx) encoder output, skips in encoder order -> (B, L, Cout)."""
    B, Lx, cx0 = x.shape
    ups = params["up"]
    n = len(ups)

    in_specs = [pl.BlockSpec((1, Lx, cx0), lambda b: (b, 0, 0))]
    args = [x]
    cur_len = Lx
    for k in range(n):
        skip = skips[-(k + 1)]
        # TODO(synk): torch's F.pad length-mismatch branch (diff != 0) is not
        # implemented; lengths always match here because L % 2**len(hidden) == 0.
        assert skip.shape[1] == 2 * cur_len
        in_specs.append(pl.BlockSpec((1, skip.shape[1], skip.shape[2]),
                                     lambda b: (b, 0, 0)))
        args.append(skip)
        cur_len *= 2

    scratch = []
    length = Lx
    for p in ups:
        cxk, co = p["w1x"].shape[1], p["w1x"].shape[2]
        cs = p["w1s"].shape[1]
        in_specs += [
            pl.BlockSpec((3, cxk, co), lambda b: (0, 0, 0)),
            pl.BlockSpec((3, cs, co), lambda b: (0, 0, 0)),
            pl.BlockSpec((2, co), lambda b: (0, 0)),
            pl.BlockSpec((3, co, co), lambda b: (0, 0, 0)),
            pl.BlockSpec((2, co), lambda b: (0, 0)),
        ]
        args += [p["w1x"], p["w1s"], p["sb1"], p["w2"], p["sb2"]]
        lu = 2 * length
        scratch += [pltpu.VMEM((length + 2, cxk), F32),   # upsample edge clamp
                    pltpu.VMEM((lu + 2, cxk), F32),       # zero-padded upsample
                    pltpu.VMEM((lu + 2, cs), F32),        # zero-padded skip
                    pltpu.VMEM((lu + 2, co), F32)]        # zero-padded conv1 out
        length = lu

    cout = ups[-1]["w1x"].shape[2]
    return pl.pallas_call(
        functools.partial(_decoder_kernel, n_blocks=n),
        grid=(B,),
        in_specs=in_specs,
        out_shape=jax.ShapeDtypeStruct((B, cur_len, cout), F32),
        out_specs=pl.BlockSpec((1, cur_len, cout), lambda b: (b, 0, 0)),
        scratch_shapes=scratch,
        compiler_params=_compiler_params(),
    )(*args)


# ---------------------------------------------------------------------------
# Parameter init (deterministic, PyTorch-like conv init; eval BN stats)
# ---------------------------------------------------------------------------
def _init_conv_bn(key, cin, cout):
    kw, kb, kg, kbe = jax.random.split(key, 4)
    bound = 1.0 / jnp.sqrt(jnp.float32(cin * 3))
    w_torch = jax.random.uniform(kw, (cout, cin, 3), F32, -bound, bound)
    b_conv = jax.random.uniform(kb, (cout,), F32, -bound, bound)
    gamma = 1.0 + 0.1 * jax.random.normal(kg, (cout,), F32)
    beta = 0.1 * jax.random.normal(kbe, (cout,), F32)
    run_mean = jnp.zeros((cout,), F32)
    run_var = jnp.ones((cout,), F32)
    # Fold conv bias + BN(eval) into a per-channel scale/bias epilogue.
    scale = gamma / jnp.sqrt(run_var + BN_EPS)
    bias = (b_conv - run_mean) * scale + beta
    w = jnp.transpose(w_torch, (2, 1, 0))          # (Cout, Cin, 3) -> (3, Cin, Cout)
    sb = jnp.stack([scale, bias], axis=0)          # (2, Cout)
    return w, sb


def init_down_block(key, cin, cout):
    k1, k2 = jax.random.split(key)
    w1, sb1 = _init_conv_bn(k1, cin, cout)
    w2, sb2 = _init_conv_bn(k2, cout, cout)
    return dict(w1=w1, sb1=sb1, w2=w2, sb2=sb2)


def init_up_block(key, c_skip, cout):
    # conv1 in_channels = 2*c_skip; first half acts on the upsampled x,
    # second half on the skip (torch.cat([x, skip], dim=1) order).
    k1, k2 = jax.random.split(key)
    w1, sb1 = _init_conv_bn(k1, 2 * c_skip, cout)
    w2, sb2 = _init_conv_bn(k2, cout, cout)
    return dict(w1x=w1[:, :c_skip, :], w1s=w1[:, c_skip:, :],
                sb1=sb1, w2=w2, sb2=sb2)


def init_unet_params(key, in_channels, out_channels, hidden):
    n = len(hidden)
    keys = jax.random.split(key, 2 * n)
    down, cin = [], in_channels
    for i, h in enumerate(hidden):
        down.append(init_down_block(keys[i], cin, h))
        cin = h
    up, j = [], n
    for i in range(n - 1, 0, -1):
        up.append(init_up_block(keys[j], hidden[i], hidden[i - 1]))
        j += 1
    up.append(init_up_block(keys[j], hidden[0], out_channels))
    return dict(down=down, up=up)


# ---------------------------------------------------------------------------
if __name__ == "__main__":
    key = jax.random.PRNGKey(0)
    pkey, xkey = jax.random.split(key)

    B, Cin, L = 2, 4, 16
    hidden = [8, 16, 32]
    Cout = 4

    params = init_unet_params(pkey, Cin, Cout, hidden)

    # PyTorch input would be NCL (B, Cin, L); kernel layout is (B, L, C).
    x_ncl = jax.random.normal(xkey, (B, Cin, L), F32)
    x = jnp.transpose(x_ncl, (0, 2, 1))

    enc, skips = unet_encoder(params, x)          # encoder=True path
    dec = unet_decoder(params, enc, skips)        # encoder=False path

    enc = jax.block_until_ready(enc)
    dec = jax.block_until_ready(dec)

    assert enc.shape == (B, L // (2 ** len(hidden)), hidden[-1])
    assert dec.shape == (B, L, Cout)
    assert [s.shape for s in skips] == [(B, L, hidden[0]),
                                        (B, L // 2, hidden[1]),
                                        (B, L // 4, hidden[2])]
    assert not bool(jnp.isnan(dec).any())
    assert not bool(jnp.isnan(enc).any())
    print("KERNEL_OK")
</pallas_src>

<mosaic_0001>
module attributes {stable_mosaic.version = 11 : i64} {
  func.func @_encoder_kernel(%arg0: i32, %arg1: memref<1x16x4xf32, #tpu.memory_space<vmem>>, %arg2: memref<3x4x8xf32, #tpu.memory_space<vmem>>, %arg3: memref<2x8xf32, #tpu.memory_space<vmem>>, %arg4: memref<3x8x8xf32, #tpu.memory_space<vmem>>, %arg5: memref<2x8xf32, #tpu.memory_space<vmem>>, %arg6: memref<3x8x16xf32, #tpu.memory_space<vmem>>, %arg7: memref<2x16xf32, #tpu.memory_space<vmem>>, %arg8: memref<3x16x16xf32, #tpu.memory_space<vmem>>, %arg9: memref<2x16xf32, #tpu.memory_space<vmem>>, %arg10: memref<3x16x32xf32, #tpu.memory_space<vmem>>, %arg11: memref<2x32xf32, #tpu.memory_space<vmem>>, %arg12: memref<3x32x32xf32, #tpu.memory_space<vmem>>, %arg13: memref<2x32xf32, #tpu.memory_space<vmem>>, %arg14: memref<1x16x8xf32, #tpu.memory_space<vmem>>, %arg15: memref<1x8x16xf32, #tpu.memory_space<vmem>>, %arg16: memref<1x4x32xf32, #tpu.memory_space<vmem>>, %arg17: memref<1x2x32xf32, #tpu.memory_space<vmem>>, %arg18: memref<18x4xf32, #tpu.memory_space<vmem>>, %arg19: memref<18x8xf32, #tpu.memory_space<vmem>>, %arg20: memref<10x8xf32, #tpu.memory_space<vmem>>, %arg21: memref<10x16xf32, #tpu.memory_space<vmem>>, %arg22: memref<6x16xf32, #tpu.memory_space<vmem>>, %arg23: memref<6x32xf32, #tpu.memory_space<vmem>>) attributes {dimension_semantics = [#tpu.dimension_semantics<parallel>], iteration_bounds = array<i64: 2>, scalar_prefetch = 0 : i64, scratch_operands = 6 : i64, tpu.core_type = #tpu.core_type<tc>, window_params = [{transform_indices = @transform_0, window_bounds = array<i64: 1, 16, 4>}, {pipeline_mode = #tpu.pipeline_mode<synchronous>, transform_indices = @transform_1, window_bounds = array<i64: 3, 4, 8>}, {pipeline_mode = #tpu.pipeline_mode<synchronous>, transform_indices = @transform_2, window_bounds = array<i64: 2, 8>}, {pipeline_mode = #tpu.pipeline_mode<synchronous>, transform_indices = @transform_3, window_bounds = array<i64: 3, 8, 8>}, {pipeline_mode = #tpu.pipeline_mode<synchronous>, transform_indices = @transform_4, window_bounds = array<i64: 2, 8>}, {pipeline_mode = #tpu.pipeline_mode<synchronous>, transform_indices = @transform_5, window_bounds = array<i64: 3, 8, 16>}, {pipeline_mode = #tpu.pipeline_mode<synchronous>, transform_indices = @transform_6, window_bounds = array<i64: 2, 16>}, {pipeline_mode = #tpu.pipeline_mode<synchronous>, transform_indices = @transform_7, window_bounds = array<i64: 3, 16, 16>}, {pipeline_mode = #tpu.pipeline_mode<synchronous>, transform_indices = @transform_8, window_bounds = array<i64: 2, 16>}, {pipeline_mode = #tpu.pipeline_mode<synchronous>, transform_indices = @transform_9, window_bounds = array<i64: 3, 16, 32>}, {pipeline_mode = #tpu.pipeline_mode<synchronous>, transform_indices = @transform_10, window_bounds = array<i64: 2, 32>}, {pipeline_mode = #tpu.pipeline_mode<synchronous>, transform_indices = @transform_11, window_bounds = array<i64: 3, 32, 32>}, {pipeline_mode = #tpu.pipeline_mode<synchronous>, transform_indices = @transform_12, window_bounds = array<i64: 2, 32>}, {transform_indices = @transform_13, window_bounds = array<i64: 1, 16, 8>}, {transform_indices = @transform_14, window_bounds = array<i64: 1, 8, 16>}, {transform_indices = @transform_15, window_bounds = array<i64: 1, 4, 32>}, {transform_indices = @transform_16, window_bounds = array<i64: 1, 2, 32>}]} {
    %c0 = arith.constant 0 : index
    %c0_0 = arith.constant 0 : index
    %c0_1 = arith.constant 0 : index
    %0 = vector.load %arg1[%c0, %c0_0, %c0_1] : memref<1x16x4xf32, #tpu.memory_space<vmem>>, vector<1x16x4xf32>
    %1 = vector.shape_cast %0 : vector<1x16x4xf32> to vector<16x4xf32>
    %cst = arith.constant 9.99999993E-9 : f32
    %2 = vector.broadcast %cst : f32 to vector<16x4xf32>
    %3 = arith.addf %1, %2 : vector<16x4xf32>
    %cst_2 = arith.constant 0.000000e+00 : f32
    %4 = vector.broadcast %cst_2 : f32 to vector<1x4xf32>
    %c0_3 = arith.constant 0 : index
    %c0_4 = arith.constant 0 : index
    %5 = vector.load %arg18[%c0_3, %c0_4] : memref<18x4xf32, #tpu.memory_space<vmem>>, vector<1x4xf32>
    tpu.vector_store %arg18[%c0_3, %c0_4], %4 {strides = array<i32>} : memref<18x4xf32, #tpu.memory_space<vmem>>, vector<1x4xf32>,
    %c17 = arith.constant 17 : index
    %c0_5 = arith.constant 0 : index
    %6 = vector.load %arg18[%c17, %c0_5] : memref<18x4xf32, #tpu.memory_space<vmem>>, vector<1x4xf32>
    tpu.vector_store %arg18[%c17, %c0_5], %4 {strides = array<i32>} : memref<18x4xf32, #tpu.memory_space<vmem>>, vector<1x4xf32>,
    %c1 = arith.constant 1 : index
    %c0_6 = arith.constant 0 : index
    %7 = vector.load %arg18[%c1, %c0_6] : memref<18x4xf32, #tpu.memory_space<vmem>>, vector<16x4xf32>
    tpu.vector_store %arg18[%c1, %c0_6], %3 {strides = array<i32>} : memref<18x4xf32, #tpu.memory_space<vmem>>, vector<16x4xf32>,
    %c0_7 = arith.constant 0 : index
    %c0_8 = arith.constant 0 : index
    %8 = vector.load %arg18[%c0_7, %c0_8] : memref<18x4xf32, #tpu.memory_space<vmem>>, vector<16x4xf32>
    %c0_9 = arith.constant 0 : index
    %c0_10 = arith.constant 0 : index
    %c0_11 = arith.constant 0 : index
    %9 = vector.load %arg2[%c0_9, %c0_10, %c0_11] : memref<3x4x8xf32, #tpu.memory_space<vmem>>, vector<1x4x8xf32>
    %10 = vector.shape_cast %9 : vector<1x4x8xf32> to vector<4x8xf32>
    %cst_12 = arith.constant dense<0.000000e+00> : vector<16x8xf32>
    %11 = tpu.matmul %8, %10, %cst_12 {dimension_numbers = #tpu.dot_dimension_numbers<[1], [0], [0], [1], [0, 0, 1, 1], [], []>} : vector<16x4xf32>, vector<4x8xf32>, vector<16x8xf32> -> vector<16x8xf32>
    %c1_13 = arith.constant 1 : index
    %c0_14 = arith.constant 0 : index
    %c0_15 = arith.constant 0 : index
    %12 = vector.load %arg2[%c1_13, %c0_14, %c0_15] : memref<3x4x8xf32, #tpu.memory_space<vmem>>, vector<1x4x8xf32>
    %13 = vector.shape_cast %12 : vector<1x4x8xf32> to vector<4x8xf32>
    %cst_16 = arith.constant dense<0.000000e+00> : vector<16x8xf32>
    %14 = tpu.matmul %3, %13, %cst_16 {dimension_numbers = #tpu.dot_dimension_numbers<[1], [0], [0], [1], [0, 0, 1, 1], [], []>} : vector<16x4xf32>, vector<4x8xf32>, vector<16x8xf32> -> vector<16x8xf32>
    %15 = arith.addf %11, %14 : vector<16x8xf32>
    %c2 = arith.constant 2 : index
    %c0_17 = arith.constant 0 : index
    %16 = vector.load %arg18[%c2, %c0_17] : memref<18x4xf32, #tpu.memory_space<vmem>>, vector<16x4xf32>
    %c2_18 = arith.constant 2 : index
    %c0_19 = arith.constant 0 : index
    %c0_20 = arith.constant 0 : index
    %17 = vector.load %arg2[%c2_18, %c0_19, %c0_20] : memref<3x4x8xf32, #tpu.memory_space<vmem>>, vector<1x4x8xf32>
    %18 = vector.shape_cast %17 : vector<1x4x8xf32> to vector<4x8xf32>
    %cst_21 = arith.constant dense<0.000000e+00> : vector<16x8xf32>
    %19 = tpu.matmul %16, %18, %cst_21 {dimension_numbers = #tpu.dot_dimension_numbers<[1], [0], [0], [1], [0, 0, 1, 1], [], []>} : vector<16x4xf32>, vector<4x8xf32>, vector<16x8xf32> -> vector<16x8xf32>
    %20 = arith.addf %15, %19 : vector<16x8xf32>
    %c0_22 = arith.constant 0 : index
    %c0_23 = arith.constant 0 : index
    %21 = vector.load %arg3[%c0_22, %c0_23] : memref<2x8xf32, #tpu.memory_space<vmem>>, vector<2x8xf32>
    %22 = vector.extract_strided_slice %21 {offsets = [0, 0], sizes = [1, 8], strides = [1, 1]} : vector<2x8xf32> to vector<1x8xf32>
    %23 = vector.broadcast %22 : vector<1x8xf32> to vector<16x8xf32>
    %24 = arith.mulf %20, %23 : vector<16x8xf32>
    %25 = vector.extract_strided_slice %21 {offsets = [1, 0], sizes = [1, 8], strides = [1, 1]} : vector<2x8xf32> to vector<1x8xf32>
    %26 = vector.broadcast %25 : vector<1x8xf32> to vector<16x8xf32>
    %27 = arith.addf %24, %26 : vector<16x8xf32>
    %28 = math.tanh %27 : vector<16x8xf32>
    %cst_24 = arith.constant 9.99999993E-9 : f32
    %29 = vector.broadcast %cst_24 : f32 to vector<16x8xf32>
    %30 = arith.addf %28, %29 : vector<16x8xf32>
    %cst_25 = arith.constant 0.000000e+00 : f32
    %31 = vector.broadcast %cst_25 : f32 to vector<1x8xf32>
    %c0_26 = arith.constant 0 : index
    %c0_27 = arith.constant 0 : index
    %32 = vector.load %arg19[%c0_26, %c0_27] : memref<18x8xf32, #tpu.memory_space<vmem>>, vector<1x8xf32>
    tpu.vector_store %arg19[%c0_26, %c0_27], %31 {strides = array<i32>} : memref<18x8xf32, #tpu.memory_space<vmem>>, vector<1x8xf32>,
    %c17_28 = arith.constant 17 : index
    %c0_29 = arith.constant 0 : index
    %33 = vector.load %arg19[%c17_28, %c0_29] : memref<18x8xf32, #tpu.memory_space<vmem>>, vector<1x8xf32>
    tpu.vector_store %arg19[%c17_28, %c0_29], %31 {strides = array<i32>} : memref<18x8xf32, #tpu.memory_space<vmem>>, vector<1x8xf32>,
    %c1_30 = arith.constant 1 : index
    %c0_31 = arith.constant 0 : index
    %34 = vector.load %arg19[%c1_30, %c0_31] : memref<18x8xf32, #tpu.memory_space<vmem>>, vector<16x8xf32>
    tpu.vector_store %arg19[%c1_30, %c0_31], %30 {strides = array<i32>} : memref<18x8xf32, #tpu.memory_space<vmem>>, vector<16x8xf32>,
    %c0_32 = arith.constant 0 : index
    %c0_33 = arith.constant 0 : index
    %35 = vector.load %arg19[%c0_32, %c0_33] : memref<18x8xf32, #tpu.memory_space<vmem>>, vector<16x8xf32>
    %c0_34 = arith.constant 0 : index
    %c0_35 = arith.constant 0 : index
    %c0_36 = arith.constant 0 : index
    %36 = vector.load %arg4[%c0_34, %c0_35, %c0_36] : memref<3x8x8xf32, #tpu.memory_space<vmem>>, vector<1x8x8xf32>
    %37 = vector.shape_cast %36 : vector<1x8x8xf32> to vector<8x8xf32>
    %cst_37 = arith.constant dense<0.000000e+00> : vector<16x8xf32>
    %38 = tpu.matmul %35, %37, %cst_37 {dimension_numbers = #tpu.dot_dimension_numbers<[1], [0], [0], [1], [0, 0, 1, 1], [], []>} : vector<16x8xf32>, vector<8x8xf32>, vector<16x8xf32> -> vector<16x8xf32>
    %c1_38 = arith.constant 1 : index
    %c0_39 = arith.constant 0 : index
    %c0_40 = arith.constant 0 : index
    %39 = vector.load %arg4[%c1_38, %c0_39, %c0_40] : memref<3x8x8xf32, #tpu.memory_space<vmem>>, vector<1x8x8xf32>
    %40 = vector.shape_cast %39 : vector<1x8x8xf32> to vector<8x8xf32>
    %cst_41 = arith.constant dense<0.000000e+00> : vector<16x8xf32>
    %41 = tpu.matmul %30, %40, %cst_41 {dimension_numbers = #tpu.dot_dimension_numbers<[1], [0], [0], [1], [0, 0, 1, 1], [], []>} : vector<16x8xf32>, vector<8x8xf32>, vector<16x8xf32> -> vector<16x8xf32>
    %42 = arith.addf %38, %41 : vector<16x8xf32>
    %c2_42 = arith.constant 2 : index
    %c0_43 = arith.constant 0 : index
    %43 = vector.load %arg19[%c2_42, %c0_43] : memref<18x8xf32, #tpu.memory_space<vmem>>, vector<16x8xf32>
    %c2_44 = arith.constant 2 : index
    %c0_45 = arith.constant 0 : index
    %c0_46 = arith.constant 0 : index
    %44 = vector.load %arg4[%c2_44, %c0_45, %c0_46] : memref<3x8x8xf32, #tpu.memory_space<vmem>>, vector<1x8x8xf32>
    %45 = vector.shape_cast %44 : vector<1x8x8xf32> to vector<8x8xf32>
    %cst_47 = arith.constant dense<0.000000e+00> : vector<16x8xf32>
    %46 = tpu.matmul %43, %45, %cst_47 {dimension_numbers = #tpu.dot_dimension_numbers<[1], [0], [0], [1], [0, 0, 1, 1], [], []>} : vector<16x8xf32>, vector<8x8xf32>, vector<16x8xf32> -> vector<16x8xf32>
    %47 = arith.addf %42, %46 : vector<16x8xf32>
    %c0_48 = arith.constant 0 : index
    %c0_49 = arith.constant 0 : index
    %48 = vector.load %arg5[%c0_48, %c0_49] : memref<2x8xf32, #tpu.memory_space<vmem>>, vector<2x8xf32>
    %49 = vector.extract_strided_slice %48 {offsets = [0, 0], sizes = [1, 8], strides = [1, 1]} : vector<2x8xf32> to vector<1x8xf32>
    %50 = vector.broadcast %49 : vector<1x8xf32> to vector<16x8xf32>
    %51 = arith.mulf %47, %50 : vector<16x8xf32>
    %52 = vector.extract_strided_slice %48 {offsets = [1, 0], sizes = [1, 8], strides = [1, 1]} : vector<2x8xf32> to vector<1x8xf32>
    %53 = vector.broadcast %52 : vector<1x8xf32> to vector<16x8xf32>
    %54 = arith.addf %51, %53 : vector<16x8xf32>
    %55 = math.tanh %54 : vector<16x8xf32>
    %c0_50 = arith.constant 0 : index
    %c0_51 = arith.constant 0 : index
    %c0_52 = arith.constant 0 : index
    %56 = vector.load %arg14[%c0_50, %c0_51, %c0_52] : memref<1x16x8xf32, #tpu.memory_space<vmem>>, vector<1x16x8xf32>
    %57 = vector.shape_cast %56 : vector<1x16x8xf32> to vector<16x8xf32>
    %58 = vector.shape_cast %55 : vector<16x8xf32> to vector<1x16x8xf32>
    tpu.vector_store %arg14[%c0_50, %c0_51, %c0_52], %58 {strides = array<i32>} : memref<1x16x8xf32, #tpu.memory_space<vmem>>, vector<1x16x8xf32>,
    %c0_53 = arith.constant 0 : index
    %c0_54 = arith.constant 0 : index
    %59 = vector.load %arg19[%c0_53, %c0_54] : memref<18x8xf32, #tpu.memory_space<vmem>>, vector<16x8xf32>
    tpu.vector_store %arg19[%c0_53, %c0_54], %55 {strides = array<i32>} : memref<18x8xf32, #tpu.memory_space<vmem>>, vector<16x8xf32>,
    %c0_55 = arith.constant 0 : index
    %c0_56 = arith.constant 0 : index
    %60 = tpu.strided_load %arg19[%c0_55, %c0_56] {strides = array<i32: 2, 1>} : memref<18x8xf32, #tpu.memory_space<vmem>>, vector<8x8xf32>
    %c1_57 = arith.constant 1 : index
    %c0_58 = arith.constant 0 : index
    %61 = tpu.strided_load %arg19[%c1_57, %c0_58] {strides = array<i32: 2, 1>} : memref<18x8xf32, #tpu.memory_space<vmem>>, vector<8x8xf32>
    %62 = arith.maximumf %60, %61 : vector<8x8xf32>
    %cst_59 = arith.constant 9.99999993E-9 : f32
    %63 = vector.broadcast %cst_59 : f32 to vector<8x8xf32>
    %64 = arith.addf %62, %63 : vector<8x8xf32>
    %cst_60 = arith.constant 0.000000e+00 : f32
    %65 = vector.broadcast %cst_60 : f32 to vector<1x8xf32>
    %c0_61 = arith.constant 0 : index
    %c0_62 = arith.constant 0 : index
    %66 = vector.load %arg20[%c0_61, %c0_62] : memref<10x8xf32, #tpu.memory_space<vmem>>, vector<1x8xf32>
    tpu.vector_store %arg20[%c0_61, %c0_62], %65 {strides = array<i32>} : memref<10x8xf32, #tpu.memory_space<vmem>>, vector<1x8xf32>,
    %c9 = arith.constant 9 : index
    %c0_63 = arith.constant 0 : index
    %67 = vector.load %arg20[%c9, %c0_63] : memref<10x8xf32, #tpu.memory_space<vmem>>, vector<1x8xf32>
    tpu.vector_store %arg20[%c9, %c0_63], %65 {strides = array<i32>} : memref<10x8xf32, #tpu.memory_space<vmem>>, vector<1x8xf32>,
    %c1_64 = arith.constant 1 : index
    %c0_65 = arith.constant 0 : index
    %68 = vector.load %arg20[%c1_64, %c0_65] : memref<10x8xf32, #tpu.memory_space<vmem>>, vector<8x8xf32>
    tpu.vector_store %arg20[%c1_64, %c0_65], %64 {strides = array<i32>} : memref<10x8xf32, #tpu.memory_space<vmem>>, vector<8x8xf32>,
    %c0_66 = arith.constant 0 : index
    %c0_67 = arith.constant 0 : index
    %69 = vector.load %arg20[%c0_66, %c0_67] : memref<10x8xf32, #tpu.memory_space<vmem>>, vector<8x8xf32>
    %c0_68 = arith.constant 0 : index
    %c0_69 = arith.constant 0 : index
    %c0_70 = arith.constant 0 : index
    %70 = vector.load %arg6[%c0_68, %c0_69, %c0_70] : memref<3x8x16xf32, #tpu.memory_space<vmem>>, vector<1x8x16xf32>
    %71 = vector.shape_cast %70 : vector<1x8x16xf32> to vector<8x16xf32>
    %cst_71 = arith.constant dense<0.000000e+00> : vector<8x16xf32>
    %72 = tpu.matmul %69, %71, %cst_71 {dimension_numbers = #tpu.dot_dimension_numbers<[1], [0], [0], [1], [0, 0, 1, 1], [], []>} : vector<8x8xf32>, vector<8x16xf32>, vector<8x16xf32> -> vector<8x16xf32>
    %c1_72 = arith.constant 1 : index
    %c0_73 = arith.constant 0 : index
    %c0_74 = arith.constant 0 : index
    %73 = vector.load %arg6[%c1_72, %c0_73, %c0_74] : memref<3x8x16xf32, #tpu.memory_space<vmem>>, vector<1x8x16xf32>
    %74 = vector.shape_cast %73 : vector<1x8x16xf32> to vector<8x16xf32>
    %cst_75 = arith.constant dense<0.000000e+00> : vector<8x16xf32>
    %75 = tpu.matmul %64, %74, %cst_75 {dimension_numbers = #tpu.dot_dimension_numbers<[1], [0], [0], [1], [0, 0, 1, 1], [], []>} : vector<8x8xf32>, vector<8x16xf32>, vector<8x16xf32> -> vector<8x16xf32>
    %76 = arith.addf %72, %75 : vector<8x16xf32>
    %c2_76 = arith.constant 2 : index
    %c0_77 = arith.constant 0 : index
    %77 = vector.load %arg20[%c2_76, %c0_77] : memref<10x8xf32, #tpu.memory_space<vmem>>, vector<8x8xf32>
    %c2_78 = arith.constant 2 : index
    %c0_79 = arith.constant 0 : index
    %c0_80 = arith.constant 0 : index
    %78 = vector.load %arg6[%c2_78, %c0_79, %c0_80] : memref<3x8x16xf32, #tpu.memory_space<vmem>>, vector<1x8x16xf32>
    %79 = vector.shape_cast %78 : vector<1x8x16xf32> to vector<8x16xf32>
    %cst_81 = arith.constant dense<0.000000e+00> : vector<8x16xf32>
    %80 = tpu.matmul %77, %79, %cst_81 {dimension_numbers = #tpu.dot_dimension_numbers<[1], [0], [0], [1], [0, 0, 1, 1], [], []>} : vector<8x8xf32>, vector<8x16xf32>, vector<8x16xf32> -> vector<8x16xf32>
    %81 = arith.addf %76, %80 : vector<8x16xf32>
    %c0_82 = arith.constant 0 : index
    %c0_83 = arith.constant 0 : index
    %82 = vector.load %arg7[%c0_82, %c0_83] : memref<2x16xf32, #tpu.memory_space<vmem>>, vector<2x16xf32>
    %83 = vector.extract_strided_slice %82 {offsets = [0, 0], sizes = [1, 16], strides = [1, 1]} : vector<2x16xf32> to vector<1x16xf32>
    %84 = vector.broadcast %83 : vector<1x16xf32> to vector<8x16xf32>
    %85 = arith.mulf %81, %84 : vector<8x16xf32>
    %86 = vector.extract_strided_slice %82 {offsets = [1, 0], sizes = [1, 16], strides = [1, 1]} : vector<2x16xf32> to vector<1x16xf32>
    %87 = vector.broadcast %86 : vector<1x16xf32> to vector<8x16xf32>
    %88 = arith.addf %85, %87 : vector<8x16xf32>
    %89 = math.tanh %88 : vector<8x16xf32>
    %cst_84 = arith.constant 9.99999993E-9 : f32
    %90 = vector.broadcast %cst_84 : f32 to vector<8x16xf32>
    %91 = arith.addf %89, %90 : vector<8x16xf32>
    %cst_85 = arith.constant 0.000000e+00 : f32
    %92 = vector.broadcast %cst_85 : f32 to vector<1x16xf32>
    %c0_86 = arith.constant 0 : index
    %c0_87 = arith.constant 0 : index
    %93 = vector.load %arg21[%c0_86, %c0_87] : memref<10x16xf32, #tpu.memory_space<vmem>>, vector<1x16xf32>
    tpu.vector_store %arg21[%c0_86, %c0_87], %92 {strides = array<i32>} : memref<10x16xf32, #tpu.memory_space<vmem>>, vector<1x16xf32>,
    %c9_88 = arith.constant 9 : index
    %c0_89 = arith.constant 0 : index
    %94 = vector.load %arg21[%c9_88, %c0_89] : memref<10x16xf32, #tpu.memory_space<vmem>>, vector<1x16xf32>
    tpu.vector_store %arg21[%c9_88, %c0_89], %92 {strides = array<i32>} : memref<10x16xf32, #tpu.memory_space<vmem>>, vector<1x16xf32>,
    %c1_90 = arith.constant 1 : index
    %c0_91 = arith.constant 0 : index
    %95 = vector.load %arg21[%c1_90, %c0_91] : memref<10x16xf32, #tpu.memory_space<vmem>>, vector<8x16xf32>
    tpu.vector_store %arg21[%c1_90, %c0_91], %91 {strides = array<i32>} : memref<10x16xf32, #tpu.memory_space<vmem>>, vector<8x16xf32>,
    %c0_92 = arith.constant 0 : index
    %c0_93 = arith.constant 0 : index
    %96 = vector.load %arg21[%c0_92, %c0_93] : memref<10x16xf32, #tpu.memory_space<vmem>>, vector<8x16xf32>
    %c0_94 = arith.constant 0 : index
    %c0_95 = arith.constant 0 : index
    %c0_96 = arith.constant 0 : index
    %97 = vector.load %arg8[%c0_94, %c0_95, %c0_96] : memref<3x16x16xf32, #tpu.memory_space<vmem>>, vector<1x16x16xf32>
    %98 = vector.shape_cast %97 : vector<1x16x16xf32> to vector<16x16xf32>
    %cst_97 = arith.constant dense<0.000000e+00> : vector<8x16xf32>
    %99 = tpu.matmul %96, %98, %cst_97 {dimension_numbers = #tpu.dot_dimension_numbers<[1], [0], [0], [1], [0, 0, 1, 1], [], []>} : vector<8x16xf32>, vector<16x16xf32>, vector<8x16xf32> -> vector<8x16xf32>
    %c1_98 = arith.constant 1 : index
    %c0_99 = arith.constant 0 : index
    %c0_100 = arith.constant 0 : index
    %100 = vector.load %arg8[%c1_98, %c0_99, %c0_100] : memref<3x16x16xf32, #tpu.memory_space<vmem>>, vector<1x16x16xf32>
    %101 = vector.shape_cast %100 : vector<1x16x16xf32> to vector<16x16xf32>
    %cst_101 = arith.constant dense<0.000000e+00> : vector<8x16xf32>
    %102 = tpu.matmul %91, %101, %cst_101 {dimension_numbers = #tpu.dot_dimension_numbers<[1], [0], [0], [1], [0, 0, 1, 1], [], []>} : vector<8x16xf32>, vector<16x16xf32>, vector<8x16xf32> -> vector<8x16xf32>
    %103 = arith.addf %99, %102 : vector<8x16xf32>
    %c2_102 = arith.constant 2 : index
    %c0_103 = arith.constant 0 : index
    %104 = vector.load %arg21[%c2_102, %c0_103] : memref<10x16xf32, #tpu.memory_space<vmem>>, vector<8x16xf32>
    %c2_104 = arith.constant 2 : index
    %c0_105 = arith.constant 0 : index
    %c0_106 = arith.constant 0 : index
    %105 = vector.load %arg8[%c2_104, %c0_105, %c0_106] : memref<3x16x16xf32, #tpu.memory_space<vmem>>, vector<1x16x16xf32>
    %106 = vector.shape_cast %105 : vector<1x16x16xf32> to vector<16x16xf32>
    %cst_107 = arith.constant dense<0.000000e+00> : vector<8x16xf32>
    %107 = tpu.matmul %104, %106, %cst_107 {dimension_numbers = #tpu.dot_dimension_numbers<[1], [0], [0], [1], [0, 0, 1, 1], [], []>} : vector<8x16xf32>, vector<16x16xf32>, vector<8x16xf32> -> vector<8x16xf32>
    %108 = arith.addf %103, %107 : vector<8x16xf32>
    %c0_108 = arith.constant 0 : index
    %c0_109 = arith.constant 0 : index
    %109 = vector.load %arg9[%c0_108, %c0_109] : memref<2x16xf32, #tpu.memory_space<vmem>>, vector<2x16xf32>
    %110 = vector.extract_strided_slice %109 {offsets = [0, 0], sizes = [1, 16], strides = [1, 1]} : vector<2x16xf32> to vector<1x16xf32>
    %111 = vector.broadcast %110 : vector<1x16xf32> to vector<8x16xf32>
    %112 = arith.mulf %108, %111 : vector<8x16xf32>
    %113 = vector.extract_strided_slice %109 {offsets = [1, 0], sizes = [1, 16], strides = [1, 1]} : vector<2x16xf32> to vector<1x16xf32>
    %114 = vector.broadcast %113 : vector<1x16xf32> to vector<8x16xf32>
    %115 = arith.addf %112, %114 : vector<8x16xf32>
    %116 = math.tanh %115 : vector<8x16xf32>
    %c0_110 = arith.constant 0 : index
    %c0_111 = arith.constant 0 : index
    %c0_112 = arith.constant 0 : index
    %117 = vector.load %arg15[%c0_110, %c0_111, %c0_112] : memref<1x8x16xf32, #tpu.memory_space<vmem>>, vector<1x8x16xf32>
    %118 = vector.shape_cast %117 : vector<1x8x16xf32> to vector<8x16xf32>
    %119 = vector.shape_cast %116 : vector<8x16xf32> to vector<1x8x16xf32>
    tpu.vector_store %arg15[%c0_110, %c0_111, %c0_112], %119 {strides = array<i32>} : memref<1x8x16xf32, #tpu.memory_space<vmem>>, vector<1x8x16xf32>,
    %c0_113 = arith.constant 0 : index
    %c0_114 = arith.constant 0 : index
    %120 = vector.load %arg21[%c0_113, %c0_114] : memref<10x16xf32, #tpu.memory_space<vmem>>, vector<8x16xf32>
    tpu.vector_store %arg21[%c0_113, %c0_114], %116 {strides = array<i32>} : memref<10x16xf32, #tpu.memory_space<vmem>>, vector<8x16xf32>,
    %c0_115 = arith.constant 0 : index
    %c0_116 = arith.constant 0 : index
    %121 = tpu.strided_load %arg21[%c0_115, %c0_116] {strides = array<i32: 2, 1>} : memref<10x16xf32, #tpu.memory_space<vmem>>, vector<4x16xf32>
    %c1_117 = arith.constant 1 : index
    %c0_118 = arith.constant 0 : index
    %122 = tpu.strided_load %arg21[%c1_117, %c0_118] {strides = array<i32: 2, 1>} : memref<10x16xf32, #tpu.memory_space<vmem>>, vector<4x16xf32>
    %123 = arith.maximumf %121, %122 : vector<4x16xf32>
    %cst_119 = arith.constant 9.99999993E-9 : f32
    %124 = vector.broadcast %cst_119 : f32 to vector<4x16xf32>
    %125 = arith.addf %123, %124 : vector<4x16xf32>
    %cst_120 = arith.constant 0.000000e+00 : f32
    %126 = vector.broadcast %cst_120 : f32 to vector<1x16xf32>
    %c0_121 = arith.constant 0 : index
    %c0_122 = arith.constant 0 : index
    %127 = vector.load %arg22[%c0_121, %c0_122] : memref<6x16xf32, #tpu.memory_space<vmem>>, vector<1x16xf32>
    tpu.vector_store %arg22[%c0_121, %c0_122], %126 {strides = array<i32>} : memref<6x16xf32, #tpu.memory_space<vmem>>, vector<1x16xf32>,
    %c5 = arith.constant 5 : index
    %c0_123 = arith.constant 0 : index
    %128 = vector.load %arg22[%c5, %c0_123] : memref<6x16xf32, #tpu.memory_space<vmem>>, vector<1x16xf32>
    tpu.vector_store %arg22[%c5, %c0_123], %126 {strides = array<i32>} : memref<6x16xf32, #tpu.memory_space<vmem>>, vector<1x16xf32>,
    %c1_124 = arith.constant 1 : index
    %c0_125 = arith.constant 0 : index
    %129 = vector.load %arg22[%c1_124, %c0_125] : memref<6x16xf32, #tpu.memory_space<vmem>>, vector<4x16xf32>
    tpu.vector_store %arg22[%c1_124, %c0_125], %125 {strides = array<i32>} : memref<6x16xf32, #tpu.memory_space<vmem>>, vector<4x16xf32>,
    %c0_126 = arith.constant 0 : index
    %c0_127 = arith.constant 0 : index
    %130 = vector.load %arg22[%c0_126, %c0_127] : memref<6x16xf32, #tpu.memory_space<vmem>>, vector<4x16xf32>
    %c0_128 = arith.constant 0 : index
    %c0_129 = arith.constant 0 : index
    %c0_130 = arith.constant 0 : index
    %131 = vector.load %arg10[%c0_128, %c0_129, %c0_130] : memref<3x16x32xf32, #tpu.memory_space<vmem>>, vector<1x16x32xf32>
    %132 = vector.shape_cast %131 : vector<1x16x32xf32> to vector<16x32xf32>
    %cst_131 = arith.constant dense<0.000000e+00> : vector<4x32xf32>
    %133 = tpu.matmul %130, %132, %cst_131 {dimension_numbers = #tpu.dot_dimension_numbers<[1], [0], [0], [1], [0, 0, 1, 1], [], []>} : vector<4x16xf32>, vector<16x32xf32>, vector<4x32xf32> -> vector<4x32xf32>
    %c1_132 = arith.constant 1 : index
    %c0_133 = arith.constant 0 : index
    %c0_134 = arith.constant 0 : index
    %134 = vector.load %arg10[%c1_132, %c0_133, %c0_134] : memref<3x16x32xf32, #tpu.memory_space<vmem>>, vector<1x16x32xf32>
    %135 = vector.shape_cast %134 : vector<1x16x32xf32> to vector<16x32xf32>
    %cst_135 = arith.constant dense<0.000000e+00> : vector<4x32xf32>
    %136 = tpu.matmul %125, %135, %cst_135 {dimension_numbers = #tpu.dot_dimension_numbers<[1], [0], [0], [1], [0, 0, 1, 1], [], []>} : vector<4x16xf32>, vector<16x32xf32>, vector<4x32xf32> -> vector<4x32xf32>
    %137 = arith.addf %133, %136 : vector<4x32xf32>
    %c2_136 = arith.constant 2 : index
    %c0_137 = arith.constant 0 : index
    %138 = vector.load %arg22[%c2_136, %c0_137] : memref<6x16xf32, #tpu.memory_space<vmem>>, vector<4x16xf32>
    %c2_138 = arith.constant 2 : index
    %c0_139 = arith.constant 0 : index
    %c0_140 = arith.constant 0 : index
    %139 = vector.load %arg10[%c2_138, %c0_139, %c0_140] : memref<3x16x32xf32, #tpu.memory_space<vmem>>, vector<1x16x32xf32>
    %140 = vector.shape_cast %139 : vector<1x16x32xf32> to vector<16x32xf32>
    %cst_141 = arith.constant dense<0.000000e+00> : vector<4x32xf32>
    %141 = tpu.matmul %138, %140, %cst_141 {dimension_numbers = #tpu.dot_dimension_numbers<[1], [0], [0], [1], [0, 0, 1, 1], [], []>} : vector<4x16xf32>, vector<16x32xf32>, vector<4x32xf32> -> vector<4x32xf32>
    %142 = arith.addf %137, %141 : vector<4x32xf32>
    %c0_142 = arith.constant 0 : index
    %c0_143 = arith.constant 0 : index
    %143 = vector.load %arg11[%c0_142, %c0_143] : memref<2x32xf32, #tpu.memory_space<vmem>>, vector<2x32xf32>
    %144 = vector.extract_strided_slice %143 {offsets = [0, 0], sizes = [1, 32], strides = [1, 1]} : vector<2x32xf32> to vector<1x32xf32>
    %145 = vector.broadcast %144 : vector<1x32xf32> to vector<4x32xf32>
    %146 = arith.mulf %142, %145 : vector<4x32xf32>
    %147 = vector.extract_strided_slice %143 {offsets = [1, 0], sizes = [1, 32], strides = [1, 1]} : vector<2x32xf32> to vector<1x32xf32>
    %148 = vector.broadcast %147 : vector<1x32xf32> to vector<4x32xf32>
    %149 = arith.addf %146, %148 : vector<4x32xf32>
    %150 = math.tanh %149 : vector<4x32xf32>
    %cst_144 = arith.constant 9.99999993E-9 : f32
    %151 = vector.broadcast %cst_144 : f32 to vector<4x32xf32>
    %152 = arith.addf %150, %151 : vector<4x32xf32>
    %cst_145 = arith.constant 0.000000e+00 : f32
    %153 = vector.broadcast %cst_145 : f32 to vector<1x32xf32>
    %c0_146 = arith.constant 0 : index
    %c0_147 = arith.constant 0 : index
    %154 = vector.load %arg23[%c0_146, %c0_147] : memref<6x32xf32, #tpu.memory_space<vmem>>, vector<1x32xf32>
    tpu.vector_store %arg23[%c0_146, %c0_147], %153 {strides = array<i32>} : memref<6x32xf32, #tpu.memory_space<vmem>>, vector<1x32xf32>,
    %c5_148 = arith.constant 5 : index
    %c0_149 = arith.constant 0 : index
    %155 = vector.load %arg23[%c5_148, %c0_149] : memref<6x32xf32, #tpu.memory_space<vmem>>, vector<1x32xf32>
    tpu.vector_store %arg23[%c5_148, %c0_149], %153 {strides = array<i32>} : memref<6x32xf32, #tpu.memory_space<vmem>>, vector<1x32xf32>,
    %c1_150 = arith.constant 1 : index
    %c0_151 = arith.constant 0 : index
    %156 = vector.load %arg23[%c1_150, %c0_151] : memref<6x32xf32, #tpu.memory_space<vmem>>, vector<4x32xf32>
    tpu.vector_store %arg23[%c1_150, %c0_151], %152 {strides = array<i32>} : memref<6x32xf32, #tpu.memory_space<vmem>>, vector<4x32xf32>,
    %c0_152 = arith.constant 0 : index
    %c0_153 = arith.constant 0 : index
    %157 = vector.load %arg23[%c0_152, %c0_153] : memref<6x32xf32, #tpu.memory_space<vmem>>, vector<4x32xf32>
    %c0_154 = arith.constant 0 : index
    %c0_155 = arith.constant 0 : index
    %c0_156 = arith.constant 0 : index
    %158 = vector.load %arg12[%c0_154, %c0_155, %c0_156] : memref<3x32x32xf32, #tpu.memory_space<vmem>>, vector<1x32x32xf32>
    %159 = vector.shape_cast %158 : vector<1x32x32xf32> to vector<32x32xf32>
    %cst_157 = arith.constant dense<0.000000e+00> : vector<4x32xf32>
    %160 = tpu.matmul %157, %159, %cst_157 {dimension_numbers = #tpu.dot_dimension_numbers<[1], [0], [0], [1], [0, 0, 1, 1], [], []>} : vector<4x32xf32>, vector<32x32xf32>, vector<4x32xf32> -> vector<4x32xf32>
    %c1_158 = arith.constant 1 : index
    %c0_159 = arith.constant 0 : index
    %c0_160 = arith.constant 0 : index
    %161 = vector.load %arg12[%c1_158, %c0_159, %c0_160] : memref<3x32x32xf32, #tpu.memory_space<vmem>>, vector<1x32x32xf32>
    %162 = vector.shape_cast %161 : vector<1x32x32xf32> to vector<32x32xf32>
    %cst_161 = arith.constant dense<0.000000e+00> : vector<4x32xf32>
    %163 = tpu.matmul %152, %162, %cst_161 {dimension_numbers = #tpu.dot_dimension_numbers<[1], [0], [0], [1], [0, 0, 1, 1], [], []>} : vector<4x32xf32>, vector<32x32xf32>, vector<4x32xf32> -> vector<4x32xf32>
    %164 = arith.addf %160, %163 : vector<4x32xf32>
    %c2_162 = arith.constant 2 : index
    %c0_163 = arith.constant 0 : index
    %165 = vector.load %arg23[%c2_162, %c0_163] : memref<6x32xf32, #tpu.memory_space<vmem>>, vector<4x32xf32>
    %c2_164 = arith.constant 2 : index
    %c0_165 = arith.constant 0 : index
    %c0_166 = arith.constant 0 : index
    %166 = vector.load %arg12[%c2_164, %c0_165, %c0_166] : memref<3x32x32xf32, #tpu.memory_space<vmem>>, vector<1x32x32xf32>
    %167 = vector.shape_cast %166 : vector<1x32x32xf32> to vector<32x32xf32>
    %cst_167 = arith.constant dense<0.000000e+00> : vector<4x32xf32>
    %168 = tpu.matmul %165, %167, %cst_167 {dimension_numbers = #tpu.dot_dimension_numbers<[1], [0], [0], [1], [0, 0, 1, 1], [], []>} : vector<4x32xf32>, vector<32x32xf32>, vector<4x32xf32> -> vector<4x32xf32>
    %169 = arith.addf %164, %168 : vector<4x32xf32>
    %c0_168 = arith.constant 0 : index
    %c0_169 = arith.constant 0 : index
    %170 = vector.load %arg13[%c0_168, %c0_169] : memref<2x32xf32, #tpu.memory_space<vmem>>, vector<2x32xf32>
    %171 = vector.extract_strided_slice %170 {offsets = [0, 0], sizes = [1, 32], strides = [1, 1]} : vector<2x32xf32> to vector<1x32xf32>
    %172 = vector.broadcast %171 : vector<1x32xf32> to vector<4x32xf32>
    %173 = arith.mulf %169, %172 : vector<4x32xf32>
    %174 = vector.extract_strided_slice %170 {offsets = [1, 0], sizes = [1, 32], strides = [1, 1]} : vector<2x32xf32> to vector<1x32xf32>
    %175 = vector.broadcast %174 : vector<1x32xf32> to vector<4x32xf32>
    %176 = arith.addf %173, %175 : vector<4x32xf32>
    %177 = math.tanh %176 : vector<4x32xf32>
    %c0_170 = arith.constant 0 : index
    %c0_171 = arith.constant 0 : index
    %c0_172 = arith.constant 0 : index
    %178 = vector.load %arg16[%c0_170, %c0_171, %c0_172] : memref<1x4x32xf32, #tpu.memory_space<vmem>>, vector<1x4x32xf32>
    %179 = vector.shape_cast %178 : vector<1x4x32xf32> to vector<4x32xf32>
    %180 = vector.shape_cast %177 : vector<4x32xf32> to vector<1x4x32xf32>
    tpu.vector_store %arg16[%c0_170, %c0_171, %c0_172], %180 {strides = array<i32>} : memref<1x4x32xf32, #tpu.memory_space<vmem>>, vector<1x4x32xf32>,
    %c0_173 = arith.constant 0 : index
    %c0_174 = arith.constant 0 : index
    %181 = vector.load %arg23[%c0_173, %c0_174] : memref<6x32xf32, #tpu.memory_space<vmem>>, vector<4x32xf32>
    tpu.vector_store %arg23[%c0_173, %c0_174], %177 {strides = array<i32>} : memref<6x32xf32, #tpu.memory_space<vmem>>, vector<4x32xf32>,
    %c0_175 = arith.constant 0 : index
    %c0_176 = arith.constant 0 : index
    %182 = tpu.strided_load %arg23[%c0_175, %c0_176] {strides = array<i32: 2, 1>} : memref<6x32xf32, #tpu.memory_space<vmem>>, vector<2x32xf32>
    %c1_177 = arith.constant 1 : index
    %c0_178 = arith.constant 0 : index
    %183 = tpu.strided_load %arg23[%c1_177, %c0_178] {strides = array<i32: 2, 1>} : memref<6x32xf32, #tpu.memory_space<vmem>>, vector<2x32xf32>
    %184 = arith.maximumf %182, %183 : vector<2x32xf32>
    %c0_179 = arith.constant 0 : index
    %c0_180 = arith.constant 0 : index
    %c0_181 = arith.constant 0 : index
    %185 = vector.load %arg17[%c0_179, %c0_180, %c0_181] : memref<1x2x32xf32, #tpu.memory_space<vmem>>, vector<1x2x32xf32>
    %186 = vector.shape_cast %185 : vector<1x2x32xf32> to vector<2x32xf32>
    %187 = vector.shape_cast %184 : vector<2x32xf32> to vector<1x2x32xf32>
    tpu.vector_store %arg17[%c0_179, %c0_180, %c0_181], %187 {strides = array<i32>} : memref<1x2x32xf32, #tpu.memory_space<vmem>>, vector<1x2x32xf32>,
    return
  }
  func.func @transform_0(%arg0: i32) -> (i32, i32, i32) {
    %c0_i32 = arith.constant 0 : i32
    %c0_i32_0 = arith.constant 0 : i32
    %c0_i32_1 = arith.constant 0 : i32
    return %arg0, %c0_i32, %c0_i32_0 : i32, i32, i32
  }
  func.func @transform_1(%arg0: i32) -> (i32, i32, i32) {
    %c0_i32 = arith.constant 0 : i32
    %c0_i32_0 = arith.constant 0 : i32
    %c0_i32_1 = arith.constant 0 : i32
    %c0_i32_2 = arith.constant 0 : i32
    return %c0_i32, %c0_i32_0, %c0_i32_1 : i32, i32, i32
  }
  func.func @transform_2(%arg0: i32) -> (i32, i32) {
    %c0_i32 = arith.constant 0 : i32
    %c0_i32_0 = arith.constant 0 : i32
    %c0_i32_1 = arith.constant 0 : i32
    return %c0_i32, %c0_i32_0 : i32, i32
  }
  func.func @transform_3(%arg0: i32) -> (i32, i32, i32) {
    %c0_i32 = arith.constant 0 : i32
    %c0_i32_0 = arith.constant 0 : i32
    %c0_i32_1 = arith.constant 0 : i32
    %c0_i32_2 = arith.constant 0 : i32
    return %c0_i32, %c0_i32_0, %c0_i32_1 : i32, i32, i32
  }
  func.func @transform_4(%arg0: i32) -> (i32, i32) {
    %c0_i32 = arith.constant 0 : i32
    %c0_i32_0 = arith.constant 0 : i32
    %c0_i32_1 = arith.constant 0 : i32
    return %c0_i32, %c0_i32_0 : i32, i32
  }
  func.func @transform_5(%arg0: i32) -> (i32, i32, i32) {
    %c0_i32 = arith.constant 0 : i32
    %c0_i32_0 = arith.constant 0 : i32
    %c0_i32_1 = arith.constant 0 : i32
    %c0_i32_2 = arith.constant 0 : i32
    return %c0_i32, %c0_i32_0, %c0_i32_1 : i32, i32, i32
  }
  func.func @transform_6(%arg0: i32) -> (i32, i32) {
    %c0_i32 = arith.constant 0 : i32
    %c0_i32_0 = arith.constant 0 : i32
    %c0_i32_1 = arith.constant 0 : i32
    return %c0_i32, %c0_i32_0 : i32, i32
  }
  func.func @transform_7(%arg0: i32) -> (i32, i32, i32) {
    %c0_i32 = arith.constant 0 : i32
    %c0_i32_0 = arith.constant 0 : i32
    %c0_i32_1 = arith.constant 0 : i32
    %c0_i32_2 = arith.constant 0 : i32
    return %c0_i32, %c0_i32_0, %c0_i32_1 : i32, i32, i32
  }
  func.func @transform_8(%arg0: i32) -> (i32, i32) {
    %c0_i32 = arith.constant 0 : i32
    %c0_i32_0 = arith.constant 0 : i32
    %c0_i32_1 = arith.constant 0 : i32
    return %c0_i32, %c0_i32_0 : i32, i32
  }
  func.func @transform_9(%arg0: i32) -> (i32, i32, i32) {
    %c0_i32 = arith.constant 0 : i32
    %c0_i32_0 = arith.constant 0 : i32
    %c0_i32_1 = arith.constant 0 : i32
    %c0_i32_2 = arith.constant 0 : i32
    return %c0_i32, %c0_i32_0, %c0_i32_1 : i32, i32, i32
  }
  func.func @transform_10(%arg0: i32) -> (i32, i32) {
    %c0_i32 = arith.constant 0 : i32
    %c0_i32_0 = arith.constant 0 : i32
    %c0_i32_1 = arith.constant 0 : i32
    return %c0_i32, %c0_i32_0 : i32, i32
  }
  func.func @transform_11(%arg0: i32) -> (i32, i32, i32) {
    %c0_i32 = arith.constant 0 : i32
    %c0_i32_0 = arith.constant 0 : i32
    %c0_i32_1 = arith.constant 0 : i32
    %c0_i32_2 = arith.constant 0 : i32
    return %c0_i32, %c0_i32_0, %c0_i32_1 : i32, i32, i32
  }
  func.func @transform_12(%arg0: i32) -> (i32, i32) {
    %c0_i32 = arith.constant 0 : i32
    %c0_i32_0 = arith.constant 0 : i32
    %c0_i32_1 = arith.constant 0 : i32
    return %c0_i32, %c0_i32_0 : i32, i32
  }
  func.func @transform_13(%arg0: i32) -> (i32, i32, i32) {
    %c0_i32 = arith.constant 0 : i32
    %c0_i32_0 = arith.constant 0 : i32
    %c0_i32_1 = arith.constant 0 : i32
    return %arg0, %c0_i32, %c0_i32_0 : i32, i32, i32
  }
  func.func @transform_14(%arg0: i32) -> (i32, i32, i32) {
    %c0_i32 = arith.constant 0 : i32
    %c0_i32_0 = arith.constant 0 : i32
    %c0_i32_1 = arith.constant 0 : i32
    return %arg0, %c0_i32, %c0_i32_0 : i32, i32, i32
  }
  func.func @transform_15(%arg0: i32) -> (i32, i32, i32) {
    %c0_i32 = arith.constant 0 : i32
    %c0_i32_0 = arith.constant 0 : i32
    %c0_i32_1 = arith.constant 0 : i32
    return %arg0, %c0_i32, %c0_i32_0 : i32, i32, i32
  }
  func.func @transform_16(%arg0: i32) -> (i32, i32, i32) {
    %c0_i32 = arith.constant 0 : i32
    %c0_i32_0 = arith.constant 0 : i32
    %c0_i32_1 = arith.constant 0 : i32
    return %arg0, %c0_i32, %c0_i32_0 : i32, i32, i32
  }
}

</mosaic_0001>

<bundles_post_ra>
// kernel: tpu_custom_call.1
= control target key start
LH: loop header
LB: loop body
LE: loop exit
PB: predicated region body
PF: predicated region fallthrough
CT: control target
= control target key end

     0   :  { %s3653_s0 = inlined_call_operand.vmem [shape: f32[2,16,4], index: 0, kind: input, shape index: {}]   ;;  %s3654_s1 = inlined_call_operand.hbm [shape: f32[3,4,8], index: 1, kind: input, shape index: {}]   ;;  %s3655_s2 = inlined_call_operand.vmem [shape: f32[2,8], index: 2, kind: input, shape index: {}]   ;;  %s3656_s3 = inlined_call_operand.hbm [shape: f32[3,8,8], index: 3, kind: input, shape index: {}]   ;;  %s3657_s4 = inlined_call_operand.vmem [shape: f32[2,8], index: 4, kind: input, shape index: {}]   ;;  %s3658_s5 = inlined_call_operand.hbm [shape: f32[3,8,16], index: 5, kind: input, shape index: {}]   ;;  %s3659_s6 = inlined_call_operand.hbm [shape: f32[2,16], index: 6, kind: input, shape index: {}]   ;;  %s3660_s7 = inlined_call_operand.vmem [shape: f32[3,16,16], index: 7, kind: input, shape index: {}]   ;;  %s3661_s8 = inlined_call_operand.vmem [shape: f32[2,16], index: 8, kind: input, shape index: {}]   ;;  %s3662_s9 = inlined_call_operand.hbm [shape: f32[3,16,32], index: 9, kind: input, shape index: {}]   ;;  %s3663_s10 = inlined_call_operand.vmem [shape: f32[2,32], index: 10, kind: input, shape index: {}]   ;;  %s3664_s11 = inlined_call_operand.hbm [shape: f32[3,32,32], index: 11, kind: input, shape index: {}]   ;;  %s3665_s12 = inlined_call_operand.vmem [shape: f32[2,32], index: 12, kind: input, shape index: {}]   ;;  %s3666_s13 = inlined_call_operand.vmem [shape: f32[2,16,8], index: 13, kind: output, shape index: {0}]   ;;  %s3667_s14 = inlined_call_operand.hbm [shape: f32[2,8,16], index: 14, kind: output, shape index: {1}]   ;;  %s3668_s15 = inlined_call_operand.hbm [shape: f32[2,4,32], index: 15, kind: output, shape index: {2}]   ;;  %s3669_s16 = inlined_call_operand.hbm [shape: f32[2,2,32], index: 16, kind: output, shape index: {3}]  }
   0x1   :  { %3686 = sst [smem:[#allocation35_spill]] %s3653_s0 }
   0x2   :  { %3687 = sst [smem:[#allocation36_spill]] %s3656_s3 }
   0x3   :  { %3688 = sst [smem:[#allocation37_spill]] %s3669_s16 }
   0x4   :  { %22 = vsyncpa [#allocation9], 0 }
   0x5   :  { %23 = vsyncpa [#allocation12], 0 }
   0x6   :  { %24 = vsyncpa [#allocation15], 0 }
   0x7   :  { %25 = vsyncpa [#allocation18], 0 }
   0x8   :  { %26 = vsyncpa [#allocation10], 0 }
   0x9   :  { %28 = vsyncpa [#allocation10 + $0x1], 0 }
   0xa   :  { %29 = vsyncpa [#allocation21], 0 }
   0xb   :  { %31 = vsyncpa [#allocation21 + $0x1], 0  ;;  %s3243_s21 = smov 0   ;;  %s3245_s22 = smov 0  }
   0xc   :  { %s3247_s23 = smov 0   ;;  %s3249_s24 = smov 0  }
   0xd LB: > { %3689 = sst [smem:[#allocation29_spill]] %s3129_s21  ;;  %s3264_s25 = sadd.s32 4294967295, %s3141_s24   ;;  %s3141_s24 = sphi %s3249_s24, %s3721_s24   ;;  %s3137_s23 = sphi %s3247_s23, %s3723_s23   ;;  %s3133_s22 = sphi %s3245_s22, %s3725_s22   ;;  %s3129_s21 = sphi %s3243_s21, %s3724_s21  }
   0xe   : > { %3690 = sst [smem:[#allocation30_spill]] %s3137_s23  ;;  %s3670_s26 = sadd.s32 4294967294, %s3141_s24  }
   0xf   : > { %3691 = sst [smem:[#allocation31_spill]] %s3141_s24  ;;  %s3268_s27 = sadd.s32 1, %s3141_s24  }
  0x10   : > { %3692 = sst [smem:[#allocation32_spill]] %s3268_s27  ;;  %s348_s28 = sadd.s32 1, %s3137_s23 }
  0x11   : > { %s345_s29 = ssub.s32 %s3141_s24, %s3268_s27  ;;  %p358_p0 = scmp.ne.s32.totalorder %s3137_s23, %s3133_s22 }
  0x12   : > { %p346_p1 = scmp.eq.s32.totalorder %s345_s29, 0  ;;  %p359_p2 = scmp.eq.s32.totalorder %s3264_s25, 1 }
  0x13   : > { %p364_p3 = scmp.ne.s32.totalorder %s3133_s22, %s3129_s21  ;;  %p365_p4 = scmp.eq.s32.totalorder %s3670_s26, 1 }
  0x14   : > { %s3281_s30 = scalar_select %p346_p1, %s3137_s23, %s348_s28  }
  0x15   : > { %p3283_p5 = por %p359_p2, %p358_p0  ;;  %p3287_p6 = por %p365_p4, %p364_p3 }
  0x16   : > { %3693 = sst [smem:[#allocation33_spill]] %s3281_s30  ;;  %p2481_p7 = scmp.ge.s32.totalorder %s3141_s24, 1 }
  0x17   : > { %s3694_s0 = scalar_select %p3283_p5, 1, 0 }
  0x18   : > { %s3695_s17 = scalar_select %p3287_p6, 1, 0 }
  0x19   : > { %p424_p8 = scmp.lt.s32.totalorder %s3141_s24, 3  ;;  %p3679_p9 = scmp.eq.s32.totalorder %s3264_s25, 0 }
  0x1a   : > { %3696 = sst [smem:[#allocation34_spill]] %s3695_s17  ;;  %s3143_s19 = smov [#allocation11]  }
  0x1b   : > { %p3294_p10 = pnand %p2481_p7, %p424_p8  ;;  %s452_s20 = sshll.u32 %s3143_s19, 4  ;;  %s453_s20 = int_to_ptr.vmem [resolvable:$true] %s452_s20 }
  0x1c   : > { %s3144_s29 = smov [#allocation14]   ;;  %s3145_s30 = smov [#allocation8]  }
  0x1d   : > { %s3697_s18 = scalar_select %p3294_p10, 1, 0 }
  0x1e   : > { %p2751_p11 = pneg %p3294_p10  ;;  %s482_s26 = sshll.u32 %s3144_s29, 4  ;;  %s483_s26 = int_to_ptr.vmem [resolvable:$true] %s482_s26 }
  0x1f   : > { %s436_s23 = sshll.u32 %s3145_s30, 4  ;;  %s2864_s19 = scalar_lea.vmem %s453_s20, 384  ;;  %s437_s23 = int_to_ptr.vmem [resolvable:$true] %s436_s23 }
  0x20   : > { %p3302_p12 = pnand %p3679_p9, %p2751_p11  ;;  %p2865_p0 = scmp.ne.s32.totalorder %s453_s20, %s2864_s19 }
  0x21   : > { %p2872_p3 = scmp.lt.s32.totalorder %s453_s20, %s453_s20  ;;  %p2873_p4 = scmp.lt.s32.totalorder %s2864_s19, %s2864_s19 }
  0x22   : > { %p3308_p13 = pneg %p3302_p12 }
  0x23   : > { %p2874_p7 = por %p2873_p4, %p2872_p3 }
  0x24   : > { %p2867_p1 = pnand %p2865_p0, %p3308_p13 }
  0x26   : > { %p2868_p2 = pneg %p2867_p1 }
  0x28   : > { %p2875_p8 = pnand %p2874_p7, %p2868_p2 }
  0x2a   : > { %2878 = shalt.err (!%p2875_p8)
}
  0x2b   : > { %s3682_s29 = smov 128   ;;  %s3684_s30 = smov 8  }
  0x2c   : > { %s3700_s3 = sld [smem:[#allocation36_spill]]  ;;  %s2890_s24 = scalar_lea.vmem %s483_s26, 32 }
  0x2d   : > { %p2891_p11 = scmp.ne.s32.totalorder %s483_s26, %s2890_s24  ;;  %p2898_p3 = scmp.lt.s32.totalorder %s483_s26, %s483_s26 }
  0x2e   : > { %p2899_p2 = scmp.lt.s32.totalorder %s2890_s24, %s2890_s24 }
  0x2f   : > { %p2893_p0 = pnand %p2891_p11, %p3308_p13 }
  0x30   : > { %p2900_p4 = por %p2899_p2, %p2898_p3 }
  0x31   : > { %p2894_p1 = pneg %p2893_p0 }
  0x32   : > { %2757 = dma.hbm_to_vmem [thread:$0]  (!%p3302_p12), %s3700_s3, 384, %s453_s20, [#allocation12], %s3682_s29, %s3682_s29, %s3684_s30  }
  0x33   : > { %p2901_p7 = pnand %p2900_p4, %p2894_p1 }
  0x35   : > { %2904 = shalt.err (!%p2901_p7)
}
  0x36   : > { %2763 = dma.hbm_to_vmem [thread:$0]  (!%p3302_p12), %s3659_s6, 32, %s483_s26, [#allocation15]  }
  0x37   : > { %s2916_s21 = scalar_lea.vmem %s437_s23, 192  ;;  %p2924_p11 = scmp.lt.s32.totalorder %s437_s23, %s437_s23 }
  0x38   : > { %p2917_p8 = scmp.ne.s32.totalorder %s437_s23, %s2916_s21  ;;  %p2925_p0 = scmp.lt.s32.totalorder %s2916_s21, %s2916_s21 }
  0x3a   : > { %p2919_p9 = pnand %p2917_p8, %p3308_p13  ;;  %p2926_p5 = por %p2925_p0, %p2924_p11 }
  0x3c   : > { %p2920_p6 = pneg %p2919_p9 }
  0x3e   : > { %p2927_p10 = pnand %p2926_p5, %p2920_p6 }
  0x40   : > { %2930 = shalt.err (!%p2927_p10)
}
  0x41   : > { %s3148_s24 = smov 64   ;;  %s3149_s17 = smov 4  }
  0x42   : > { %2754 = dma.hbm_to_vmem [thread:$0]  (!%p3302_p12), %s3654_s1, 192, %s437_s23, [#allocation9], %s3148_s24, %s3148_s24, %s3149_s17  }
  0x43   : > { %s3150_s26 = smov [#allocation13]   ;;  %s3151_s29 = smov [#allocation16]  }
  0x44   : > { %s468_s19 = sshll.u32 %s3150_s26, 4  ;;  %s498_s30 = sshll.u32 %s3151_s29, 4  ;;  %s469_s19 = int_to_ptr.vmem [resolvable:$true] %s468_s19  ;;  %s499_s30 = int_to_ptr.vmem [resolvable:$true] %s498_s30 }
  0x45   : > { %s2942_s3 = scalar_lea.vmem %s469_s19, 384  ;;  %p2950_p6 = scmp.lt.s32.totalorder %s469_s19, %s469_s19 }
  0x46   : > { %p2943_p9 = scmp.ne.s32.totalorder %s469_s19, %s2942_s3  ;;  %p2951_p10 = scmp.lt.s32.totalorder %s2942_s3, %s2942_s3 }
  0x48   : > { %p2945_p1 = pnand %p2943_p9, %p3308_p13  ;;  %p2952_p3 = por %p2951_p10, %p2950_p6 }
  0x4a   : > { %p2946_p5 = pneg %p2945_p1 }
  0x4c   : > { %p2953_p2 = pnand %p2952_p3, %p2946_p5 }
  0x4e   : > { %2956 = shalt.err (!%p2953_p2)
}
  0x4f   : > { %s3701_s21 = smov 8   ;;  %s3702_s20 = smov 128  }
  0x50   : > { %2760 = dma.hbm_to_vmem [thread:$0]  (!%p3302_p12), %s3658_s5, 384, %s469_s19, [#allocation12], %s3702_s20, %s3702_s20, %s3701_s21  }
  0x51   : > { %s2968_s29 = scalar_lea.vmem %s499_s30, 768  ;;  %p2976_p11 = scmp.lt.s32.totalorder %s499_s30, %s499_s30 }
  0x52   : > { %p2969_p4 = scmp.ne.s32.totalorder %s499_s30, %s2968_s29  ;;  %p2977_p0 = scmp.lt.s32.totalorder %s2968_s29, %s2968_s29 }
  0x54   : > { %p2971_p7 = pnand %p2969_p4, %p3308_p13  ;;  %p2978_p9 = por %p2977_p0, %p2976_p11 }
  0x56   : > { %p2972_p8 = pneg %p2971_p7 }
  0x58   : > { %p2979_p1 = pnand %p2978_p9, %p2972_p8 }
  0x5a   : > { %2982 = shalt.err (!%p2979_p1)
}
  0x5b   : > { %2766 = dma.hbm_to_vmem [thread:$0]  (!%p3302_p12), %s3662_s9, 768, %s499_s30, [#allocation15], %s3702_s20, %s3702_s20, %s3701_s21  }
  0x5c   : > { %s3152_s16 = smov [#allocation17]  }
  0x5d   : > { %s514_s26 = sshll.u32 %s3152_s16, 4  ;;  %s515_s26 = int_to_ptr.vmem [resolvable:$true] %s514_s26 }
  0x5e   : > { %s2994_s19 = scalar_lea.vmem %s515_s26, 1536  ;;  %p3002_p3 = scmp.lt.s32.totalorder %s515_s26, %s515_s26 }
  0x5f   : > { %p2995_p5 = scmp.ne.s32.totalorder %s515_s26, %s2994_s19  ;;  %p3003_p2 = scmp.lt.s32.totalorder %s2994_s19, %s2994_s19 }
  0x61   : > { %p2997_p6 = pnand %p2995_p5, %p3308_p13  ;;  %p3004_p4 = por %p3003_p2, %p3002_p3 }
  0x63   : > { %p2998_p10 = pneg %p2997_p6 }
  0x65   : > { %p3005_p7 = pnand %p3004_p4, %p2998_p10 }
  0x67   : > { %3008 = shalt.err (!%p3005_p7)
}
  0x68   : > { %2769 = dma.hbm_to_vmem [thread:$0]  (!%p3302_p12), %s3664_s11, 1536, %s515_s26, [#allocation18], %s3702_s20, %s3702_s20, %s3701_s21  }
  0x69   : > { %p3703_p8 = scmp.ne.s32.totalorder %s3697_s18, 0 }
  0x6a   : > { %p3704_p13 = scmp.eq.s32.totalorder (!%p3703_p8), %s3264_s25, 0 }
  0x6b   : > { %541 = sbr.rel (%p3703_p8) target bundleno = 1544 (0x608), region = 72 }
  0x70   : > { %3104 = dma.done.wait (%p3704_p13), [#allocation9], 192   ;;  %p3705_p11 = pmov %p3704_p13 }
  0x72   : > { %3106 = vsyncadd (%p3705_p11), [#allocation9], 4294967104  ;;  %p3706_p0 = pmov %p3705_p11 }
  0x74   : > { %3108 = dma.done.wait (%p3706_p0), [#allocation12], 768   ;;  %p3707_p9 = pmov %p3706_p0 }
  0x75   : > { %p3708_p1 = pmov %p3706_p0 }
  0x76   : > { %3110 = vsyncadd (%p3707_p9), [#allocation12], 4294966528 }
  0x77   : > { %3112 = dma.done.wait (%p3708_p1), [#allocation15], 800   ;;  %p3709_p12 = pmov %p3706_p0 }
  0x78   : > { %p3710_p5 = pmov %p3706_p0 }
  0x79   : > { %3114 = vsyncadd (%p3709_p12), [#allocation15], 4294966496 }
  0x7a   : > { %3116 = dma.done.wait (%p3710_p5), [#allocation18], 1536   ;;  %p3711_p6 = pmov %p3706_p0 }
  0x7b   : > { %p626_p10 = scmp.lt.s32.totalorder %s3264_s25, 1  ;;  %vm640_vm0 = vcmask 24576   ;;  %v3153_v0 = vmov 0.0   ;;  %vm657_vm1 = vcmask 1043456   ;;  %s3712_s20 = sld [smem:[#allocation35_spill]]  ;;  %vm643_vm2 = vcmask 31744  }
  0x7c   : > { %3118 = vsyncadd (%p3711_p6), [#allocation18], 4294965760  ;;  %641 = vst.msk [vmem:[#allocation2] sm:$0x1] %vm640_vm0, %v3153_v0  ;;  %v650_v1 = vld [vmem:[#allocation8 + $0x4] sm:$0xf]  ;;  %v911_v15 = vlaneseq }
  0x7d   : > { %s3386_s27 = scalar_select %p626_p10, %s3264_s25, 1  ;;  %642 = vst.msk [vmem:[#allocation2 + $0x11] sm:$0x1] %vm640_vm0, %v3153_v0  ;;  %2601 = vmatprep.subr.msk.mxu0 %vm657_vm1, %v650_v1  ;;  %v823_v6 = vld [vmem:[#allocation8 + $0x8] sm:$0xf]  ;;  %vm927_vm3 = vcmask 57344  }
  0x7e   : > { %2602 = vmatpush3.msk.msra.mxu0 %vm657_vm1, %v650_v1  ;;  %v648_v7 = vld [vmem:[#allocation8] sm:$0xf]  ;;  %v937_v12 = vld [vmem:[#allocation11 + $0x8] sm:$0xff]  ;;  %928 = vst.msk [vmem:[#allocation3] sm:$0x1] %vm927_vm3, %v3153_v0  ;;  %v935_v13 = vld [vmem:[#allocation11] sm:$0xff] }
  0x7f   : > { %s2542_s18 = sshll.u32 %s3386_s27, 4  ;;  %2611 = vmatprep.subr.msk.mxu0 %vm657_vm1, %v823_v6  ;;  %2606 = vmatprep.subr.msk.mxu1 %vm657_vm1, %v648_v7  ;;  %929 = vst.msk [vmem:[#allocation3 + $0x11] sm:$0x1] %vm927_vm3, %v3153_v0  ;;  %1211 = vst.msk [vmem:[#allocation4] sm:$0x1] %vm927_vm3, %v3153_v0  ;;  %v1103_v14 = vld [vmem:[#allocation11 + $0x10] sm:$0xff] }
  0x80   : > { %2607 = vmatpush3.msk.msra.mxu1 %vm657_vm1, %v648_v7  ;;  %1212 = vst.msk [vmem:[#allocation4 + $0x9] sm:$0x1] %vm927_vm3, %v3153_v0  ;;  %v912_v17 = vshrl.u32 %v911_v15, 7  ;;  %v910_v20 = vld [vmem:[%s3655_s2] sm:$0x3]  ;;  %vm930_vm4 = vcmask 64512   ;;  %s635_s23 = scalar_lea.vmem %s3666_s13, %s2542_s18 }
  0x81   : > { %s630_s24 = scalar_lea.vmem %s3712_s20, %s2542_s18  ;;  %2616 = vmatprep.subr.mxu1 %v937_v12  ;;  %v1217_v44 = vld [vmem:[#allocation13 + $0x8] sm:$0xff]  ;;  %vm3154_vm5 = vmmov 0   ;;  %v1215_v45 = vld [vmem:[#allocation13] sm:$0xff]  ;;  %v1187_v48 = vld [vmem:[%s3657_s4] sm:$0x3]  ;;  %vm1454_vm6 = vcmask 122880  }
  0x82   : > { %v636_v2 = vld [vmem:[%s630_s24] sm:$0xff]  ;;  %v637_v3 = vld [vmem:[%s630_s24 + $0x8] sm:$0xff]  ;;  %v3415_v19 = vsub.s32 0, %v912_v17  ;;  %v3420_v21 = vsub.s32 1, %v912_v17  ;;  %1455 = vst.msk [vmem:[#allocation5] sm:$0x1] %vm1454_vm6, %v3153_v0 }
  0x83   : > { %v638_v4 = vadd.f32 1e-08, %v636_v2  ;;  %v639_v5 = vadd.f32 1e-08, %v637_v3  ;;  %1456 = vst.msk [vmem:[#allocation5 + $0x9] sm:$0x1] %vm1454_vm6, %v3153_v0 }
  0x84   : > { %v914_v25 = vrot.slane %v910_v20, %v3415_v19  ;;  %v920_v28 = vrot.slane %v910_v20, %v3420_v21  ;;  %v1191_v52 = vrot.slane %v1187_v48, %v3415_v19  ;;  %v1197_v55 = vrot.slane %v1187_v48, %v3420_v21  ;;  %1708 = vst.msk [vmem:[#allocation6] sm:$0x1] %vm1454_vm6, %v3153_v0  ;;  %v1441_v15 = vld [vmem:[#allocation14] sm:$0x3]  ;;  %s3514_s30 = sand.u32 1, %s3133_s22   ;;  %s2537_s20 = sshll.u32 %s3264_s25, 7 }
  0x85   : > { %644 = vst.msk [vmem:[#allocation2 + $0x1] sm:$0xff] %vm643_vm2, %v638_v4  ;;  %645 = vst.msk [vmem:[#allocation2 + $0x9] sm:$0xff] %vm643_vm2, %v639_v5  ;;  %2603 = vmatprep.mubr.msk.f32.mxu0 %vm643_vm2, %v638_v4  ;;  %v1445_v20 = vrot.slane %v1441_v15, %v3415_v19  ;;  %vm1457_vm7 = vcmask 130048   ;;  %s2496_s27 = sshll.u32 %s3514_s30, 3  ;;  %vm1710_vm8 = vcmask 125952   ;;  %vm1955_vm9 = vcmask 253952   ;;  %s2247_s3 = scalar_lea.hbm %s3667_s14, %s2537_s20 }
  0x86   : > { %2604 = vmatmul.mubr.msk.f32.vlgmr.msra.gmra.mxu0 %vm643_vm2, %v639_v5  ;;  %1709 = vst.msk [vmem:[#allocation6 + $0x5] sm:$0x1] %vm1454_vm6, %v3153_v0  ;;  %s3518_s18 = scalar_lea.vmem [#allocation19], %s2496_s27  ;;  %vm1958_vm10 = vcmask 257024   ;;  %vm1970_vm11 = vcmask 261120   ;;  %s2223_s16 = scalar_lea.sflag [#allocation10], %s3514_s30 }
  0x87   : > { %2612 = vmatpush3.msk.msra.mxu0 %vm657_vm1, %v823_v6  ;;  %v1366_v6 = vld [vmem:[#allocation13 + $0x10] sm:$0xff]  ;;  %1956 = vst.msk [vmem:[#allocation7] sm:$0x1] %vm1955_vm9, %v3153_v0  ;;  %1957 = vst.msk [vmem:[#allocation7 + $0x5] sm:$0x1] %vm1955_vm9, %v3153_v0  ;;  %s2249_s17 = sshll.u32 %s3518_s18, 4  ;;  %s2250_s17 = int_to_ptr.vmem [resolvable:$true] %s2249_s17 }
  0x88   : > { %2621 = vmatprep.subr.mxu0 %v935_v13  ;;  %s3009_s26 = scalar_lea.vmem %s2250_s17, 128  ;;  %p3713_p2 = scmp.ne.s32.totalorder %s3694_s0, 0 }
  0x89   : > { %p3010_p3 = scmp.ne.s32.totalorder %s2250_s17, %s3009_s26  ;;  %s3155_s19 = smov [#allocation19]  }
  0x8b   : > { %p3011_p4 = pnand %p3010_p3, %p3713_p2 }
  0x8c   : > { %v646_v8 = vld [vmem:[#allocation2] sm:$0xff]  ;;  %v647_v10 = vld [vmem:[#allocation2 + $0x8] sm:$0xff] }
  0x8d   : > { %v820_v9 = vld [vmem:[#allocation2 + $0x2] sm:$0xff]  ;;  %2608 = vmatprep.mubr.msk.f32.mxu1 %vm643_vm2, %v646_v8  ;;  %v821_v11 = vld [vmem:[#allocation2 + $0xa] sm:$0xff]  ;;  %p3012_p7 = pneg %p3011_p4 }
  0x8e   : > { %2613 = vmatprep.mubr.msk.f32.mxu0 %vm643_vm2, %v820_v9  ;;  %2609 = vmatmul.mubr.msk.f32.vlgmr.msra.gmra.mxu1 %vm643_vm2, %v647_v10  ;;  %v2522_v9 = vld [vmem:[%s3660_s7 + $0x18] sm:$0xff]  ;;  %v2521_v10 = vld [vmem:[%s3660_s7 + $0x10] sm:$0xff] }
  0x8f   : > { %2614 = vmatmul.mubr.msk.f32.vlgmr.msra.gmra.mxu0 %vm643_vm2, %v821_v11  ;;  %2617 = vmatpush3.msra.mxu1 %v937_v12  ;;  %v1461_v11 = vld [vmem:[%s3660_s7 + $0x8] sm:$0xff]  ;;  %v1460_v12 = vld [vmem:[%s3660_s7] sm:$0xff] }
  0x90   : > { %2626 = vmatprep.subr.mxu1 %v1103_v14  ;;  %2622 = vmatpush3.msra.mxu0 %v935_v13 }
  0x91   : > { %2631 = vmatprep.subr.mxu0 %v3153_v0 }
 0x146   : > { %v2605_v16 = vpop.f32.mrf.mxu0 }
 0x148   : > { %v727_v18 = vpop.f32.mrf.mxu0 }
 0x14e   : > { %v2610_v22 = vpop.f32.mrf.mxu1 }
 0x14f   : > { %v2615_v23 = vpop.f32.mrf.mxu0  ;;  %v817_v24 = vadd.f32 %v2610_v22, %v2605_v16 }
 0x150   : > { %v811_v26 = vpop.f32.mrf.mxu1 }
 0x151   : > { %v909_v27 = vadd.f32 %v2615_v23, %v817_v24  ;;  %v812_v29 = vadd.f32 %v811_v26, %v727_v18  ;;  %v899_v30 = vpop.f32.mrf.mxu0 }
 0x153   : > { %v916_v31 = vmul.f32 %v914_v25, %v909_v27  ;;  %v908_v32 = vadd.f32 %v899_v30, %v812_v29  ;;  %v2526_v30 = vld [vmem:[%s3660_s7 + $0x28] sm:$0xff] }
 0x155   : > { %v922_v33 = vadd.f32 %v920_v28, %v916_v31  ;;  %v915_v34 = vmul.f32 %v914_v25, %v908_v32  ;;  %v1450_v25 = vrot.slane %v1441_v15, %v3420_v21  ;;  %v2525_v31 = vld [vmem:[%s3660_s7 + $0x20] sm:$0xff] }
 0x157   : > { %2837 = vtanh.f32 %v922_v33  ;;  %v921_v35 = vadd.f32 %v920_v28, %v915_v34  ;;  %v1717_v34 = vld [vmem:[#allocation16 + $0x18] sm:$0xff] }
 0x159   : > { %2839 = vtanh.f32 %v921_v35  ;;  %v1716_v35 = vld [vmem:[#allocation16 + $0x10] sm:$0xff] }
 0x164   : > { %v2838_v36 = vpop.eup %2837 }
 0x165   : > { %v926_v37 = vadd.f32 1e-08, %v2838_v36  ;;  %v1714_v36 = vld [vmem:[#allocation16 + $0x8] sm:$0xff] }
 0x166   : > { %v2840_v38 = vpop.eup %2839 }
 0x167   : > { %932 = vst.msk [vmem:[#allocation3 + $0x9] sm:$0xff] %vm930_vm4, %v926_v37  ;;  %v925_v39 = vadd.f32 1e-08, %v2840_v38 }
 0x169   : > { %931 = vst.msk [vmem:[#allocation3 + $0x1] sm:$0xff] %vm930_vm4, %v925_v39  ;;  %2618 = vmatprep.mubr.msk.f32.mxu1 %vm930_vm4, %v925_v39 }
 0x16a   : > { %2619 = vmatmul.mubr.msk.f32.vlgmr.msra.gmra.mxu1 %vm930_vm4, %v926_v37  ;;  %v1713_v37 = vld [vmem:[#allocation16] sm:$0xff] }
 0x16b   : > { %2627 = vmatpush3.msra.mxu1 %v1103_v14 }
 0x16c   : > { %2636 = vmatprep.subr.mxu1 %v3153_v0 }
 0x16e   : > { %v1101_v43 = vld [vmem:[#allocation3 + $0xa] sm:$0xff] }
 0x170   : > { %v933_v40 = vld [vmem:[#allocation3] sm:$0xff]  ;;  %v934_v42 = vld [vmem:[#allocation3 + $0x8] sm:$0xff] }
 0x171   : > { %v1100_v41 = vld [vmem:[#allocation3 + $0x2] sm:$0xff]  ;;  %2623 = vmatprep.mubr.msk.f32.mxu0 %vm930_vm4, %v933_v40 }
 0x172   : > { %2628 = vmatprep.mubr.msk.f32.mxu1 %vm930_vm4, %v1100_v41  ;;  %2624 = vmatmul.mubr.msk.f32.vlgmr.msra.gmra.mxu0 %vm930_vm4, %v934_v42  ;;  %v1689_v40 = vld [vmem:[%s3661_s8] sm:$0x3] }
 0x173   : > { %2629 = vmatmul.mubr.msk.f32.vlgmr.msra.gmra.mxu1 %vm930_vm4, %v1101_v43  ;;  %2632 = vmatpush3.msra.mxu0 %v1217_v44  ;;  %v1693_v44 = vrot.slane %v1689_v40, %v3415_v19  ;;  %v1698_v48 = vrot.slane %v1689_v40, %v3420_v21 }
 0x174   : > { %2633 = vmatprep.mubr.msk.f32.mxu0 %vm3154_vm5, %v3153_v0  ;;  %2641 = vmatprep.subr.mxu0 %v3153_v0 }
 0x175   : > { %2638 = vmatprep.mubr.msk.f32.mxu1 %vm3154_vm5, %v3153_v0  ;;  %2637 = vmatpush3.msra.mxu1 %v1215_v45 }
 0x176   : > { %2646 = vmatprep.subr.mxu1 %v3153_v0 }
 0x22a   : > { %v2620_v46 = vpop.f32.mrf.mxu1 }
 0x22c   : > { %v1010_v47 = vpop.f32.mrf.mxu1 }
 0x232   : > { %v2625_v49 = vpop.f32.mrf.mxu0 }
 0x233   : > { %v2630_v50 = vpop.f32.mrf.mxu1  ;;  %v1097_v51 = vadd.f32 %v2625_v49, %v2620_v46 }
 0x234   : > { %v1091_v53 = vpop.f32.mrf.mxu0 }
 0x235   : > { %v1186_v54 = vadd.f32 %v2630_v50, %v1097_v51  ;;  %v1092_v56 = vadd.f32 %v1091_v53, %v1010_v47  ;;  %v1176_v57 = vpop.f32.mrf.mxu1 }
 0x237   : > { %v1193_v58 = vmul.f32 %v1191_v52, %v1186_v54  ;;  %v1185_v59 = vadd.f32 %v1176_v57, %v1092_v56  ;;  %v1867_v56 = vld [vmem:[#allocation16 + $0x28] sm:$0xff]  ;;  %v1866_v57 = vld [vmem:[#allocation16 + $0x20] sm:$0xff] }
 0x239   : > { %v1199_v60 = vadd.f32 %v1197_v55, %v1193_v58  ;;  %v1192_v61 = vmul.f32 %v1191_v52, %v1185_v59 }
 0x23b   : > { %2841 = vtanh.f32 %v1199_v60  ;;  %v1198_v62 = vadd.f32 %v1197_v55, %v1192_v61  ;;  %v1969_v60 = vld [vmem:[#allocation17 + $0x38] sm:$0xff]  ;;  %v1968_v61 = vld [vmem:[#allocation17 + $0x30] sm:$0xff] }
 0x23d   : > { %2843 = vtanh.f32 %v1198_v62  ;;  %v1967_v62 = vld [vmem:[#allocation17 + $0x28] sm:$0xff] }
 0x248   : > { %v2842_v63 = vpop.eup %2841 }
 0x249   : > { %1203 = vst.msk [vmem:[%s635_s23 + $0x8] sm:$0xff] %vm930_vm4, %v2842_v63  ;;  %1205 = vst.msk [vmem:[#allocation3 + $0x8] sm:$0xff] %vm930_vm4, %v2842_v63  ;;  %v1966_v63 = vld [vmem:[#allocation17 + $0x20] sm:$0xff] }
 0x24a   : > { %v2844_v1 = vpop.eup %2843 }
 0x24b   : > { %1202 = vst.msk [vmem:[%s635_s23] sm:$0xff] %vm930_vm4, %v2844_v1  ;;  %1204 = vst.msk [vmem:[#allocation3] sm:$0xff] %vm930_vm4, %v2844_v1  ;;  %v1964_v1 = vld [vmem:[#allocation17 + $0x18] sm:$0xff]  ;;  %s3013_s23 = sshll.u32 %s3155_s19, 4  ;;  %s3014_s23 = int_to_ptr.vmem [resolvable:$false] %s3013_s23 }
 0x24c   : > { %s3015_s27 = scalar_lea.vmem %s3014_s23, 256  ;;  %p3016_p8 = scmp.lt.s32.totalorder %s2250_s17, %s3014_s23 }
 0x24d   : > { %p3017_p13 = scmp.lt.s32.totalorder %s3015_s27, %s3009_s26 }
 0x24f   : > { %p3018_p11 = por %p3017_p13, %p3016_p8 }
 0x251   : > { %p3019_p0 = pnand %p3018_p11, %p3012_p7 }
 0x252   : > { %v1206_v2 = vld [vmem:[#allocation3] ss:$2 sm:$0xff]  ;;  %v1208_v3 = vld [vmem:[#allocation3 + $0x1] ss:$2 sm:$0xff] }
 0x253   : > { %v1209_v4 = vmax.f32 %v1206_v2, %v1208_v3  ;;  %v1963_v2 = vld [vmem:[#allocation17 + $0x10] sm:$0xff]  ;;  %v1962_v3 = vld [vmem:[#allocation17 + $0x8] sm:$0xff] }
 0x255   : > { %v1210_v5 = vadd.f32 1e-08, %v1209_v4  ;;  %v1961_v4 = vld [vmem:[#allocation17] sm:$0xff] }
 0x257   : > { %1213 = vst.msk [vmem:[#allocation4 + $0x1] sm:$0xff] %vm930_vm4, %v1210_v5  ;;  %2634 = vmatmul.mubr.msk.f32.vlgmr.msra.gmra.mxu0 %vm930_vm4, %v1210_v5 }
 0x258   : > { %2642 = vmatpush3.msra.mxu0 %v1366_v6  ;;  %2643 = vmatprep.mubr.msk.f32.mxu0 %vm3154_vm5, %v3153_v0 }
 0x259   : > { %2653 = vmatprep.subr.mxu0 %v3153_v0 }
 0x25e   : > { %v1214_v7 = vld [vmem:[#allocation4] sm:$0xff] }
 0x25f   : > { %v1364_v8 = vld [vmem:[#allocation4 + $0x2] sm:$0xff]  ;;  %2639 = vmatmul.mubr.msk.f32.vlgmr.msra.gmra.mxu1 %vm930_vm4, %v1214_v7  ;;  %v1942_v7 = vld [vmem:[%s3663_s10] sm:$0x3] }
 0x260   : > { %2644 = vmatmul.mubr.msk.f32.vlgmr.msra.gmra.mxu0 %vm930_vm4, %v1364_v8  ;;  %2650 = vmatprep.mubr.msk.f32.mxu1 %vm3154_vm5, %v3153_v0  ;;  %v1951_v15 = vrot.slane %v1942_v7, %v3420_v21 }
 0x261   : > { %2657 = vmatprep.mubr.msk.f32.mxu0 %vm3154_vm5, %v3153_v0  ;;  %2647 = vmatpush3.msra.mxu1 %v2522_v9 }
 0x262   : > { %2648 = vmatprep.subr.mxu1 %v3153_v0  ;;  %2654 = vmatpush3.msra.mxu0 %v1461_v11  ;;  %v1946_v11 = vrot.slane %v1942_v7, %v3415_v19 }
 0x263   : > { %2649 = vmatpush3.msra.mxu1 %v2521_v10  ;;  %2655 = vmatprep.subr.mxu0 %v3153_v0 }
 0x264   : > { %2660 = vmatprep.subr.mxu1 %v3153_v0  ;;  %2656 = vmatpush3.msra.mxu0 %v1460_v12 }
 0x265   : > { %2667 = vmatprep.subr.mxu0 %v3153_v0 }
 0x317   : > { %v1287_v13 = vpop.f32.mrf.mxu0 }
 0x319   : > { %v2635_v14 = vpop.f32.mrf.mxu0 }
 0x31f   : > { %v1360_v16 = vpop.f32.mrf.mxu1 }
 0x320   : > { %v1436_v17 = vpop.f32.mrf.mxu0  ;;  %v1361_v18 = vadd.f32 %v1360_v16, %v1287_v13 }
 0x321   : > { %v2640_v22 = vpop.f32.mrf.mxu1 }
 0x322   : > { %v2645_v23 = vpop.f32.mrf.mxu0  ;;  %v1440_v24 = vadd.f32 %v1436_v17, %v1361_v18  ;;  %v2122_v22 = vld [vmem:[#allocation17 + $0x58] sm:$0xff] }
 0x323   : > { %v2121_v23 = vld [vmem:[#allocation17 + $0x50] sm:$0xff] }
 0x324   : > { %v1446_v26 = vmul.f32 %v1445_v20, %v1440_v24  ;;  %v2120_v24 = vld [vmem:[#allocation17 + $0x48] sm:$0xff] }
 0x326   : > { %v1451_v27 = vadd.f32 %v1450_v25, %v1446_v26  ;;  %v2119_v25 = vld [vmem:[#allocation17 + $0x40] sm:$0xff] }
 0x328   : > { %2845 = vtanh.f32 %v1451_v27 }
 0x335   : > { %v2846_v28 = vpop.eup %2845 }
 0x336   : > { %v1453_v29 = vadd.f32 1e-08, %v2846_v28 }
 0x338   : > { %1458 = vst.msk [vmem:[#allocation5 + $0x1] sm:$0xff] %vm1457_vm7, %v1453_v29  ;;  %2651 = vmatmul.mubr.msk.f32.vlgmr.msra.gmra.mxu1 %vm1457_vm7, %v1453_v29 }
 0x339   : > { %2661 = vmatpush3.msra.mxu1 %v2526_v30  ;;  %2664 = vmatprep.mubr.msk.f32.mxu1 %vm3154_vm5, %v3153_v0 }
 0x33a   : > { %2662 = vmatprep.subr.mxu1 %v3153_v0 }
 0x33b   : > { %2663 = vmatpush3.msra.mxu1 %v2525_v31 }
 0x33c   : > { %2674 = vmatprep.subr.mxu1 %v3153_v0 }
 0x33f   : > { %v1459_v32 = vld [vmem:[#allocation5] sm:$0xff] }
 0x340   : > { %v1611_v33 = vld [vmem:[#allocation5 + $0x2] sm:$0xff]  ;;  %2658 = vmatmul.mubr.msk.f32.vlgmr.msra.gmra.mxu0 %vm1457_vm7, %v1459_v32 }
 0x341   : > { %2665 = vmatmul.mubr.msk.f32.vlgmr.msra.gmra.mxu1 %vm1457_vm7, %v1611_v33  ;;  %2671 = vmatprep.mubr.msk.f32.mxu0 %vm3154_vm5, %v3153_v0 }
 0x342   : > { %2678 = vmatprep.mubr.msk.f32.mxu1 %vm3154_vm5, %v3153_v0  ;;  %2668 = vmatpush3.msra.mxu0 %v1717_v34 }
 0x343   : > { %2669 = vmatprep.subr.mxu0 %v3153_v0  ;;  %2675 = vmatpush3.msra.mxu1 %v1714_v36 }
 0x344   : > { %2670 = vmatpush3.msra.mxu0 %v1716_v35  ;;  %2676 = vmatprep.subr.mxu1 %v3153_v0 }
 0x345   : > { %2681 = vmatprep.subr.mxu0 %v3153_v0  ;;  %2677 = vmatpush3.msra.mxu1 %v1713_v37 }
 0x346   : > { %2688 = vmatprep.subr.mxu1 %v3153_v0 }
 0x3f8   : > { %v1534_v38 = vpop.f32.mrf.mxu1 }
 0x3fa   : > { %v2652_v39 = vpop.f32.mrf.mxu1 }
 0x400   : > { %v1607_v41 = vpop.f32.mrf.mxu0 }
 0x401   : > { %v1684_v42 = vpop.f32.mrf.mxu1  ;;  %v1608_v43 = vadd.f32 %v1607_v41, %v1534_v38 }
 0x402   : > { %v2659_v45 = vpop.f32.mrf.mxu0 }
 0x403   : > { %v2666_v46 = vpop.f32.mrf.mxu1  ;;  %v1688_v47 = vadd.f32 %v1684_v42, %v1608_v43 }
 0x405   : > { %v1694_v49 = vmul.f32 %v1693_v44, %v1688_v47 }
 0x407   : > { %v1699_v50 = vadd.f32 %v1698_v48, %v1694_v49 }
 0x409   : > { %2847 = vtanh.f32 %v1699_v50 }
 0x416   : > { %v2848_v51 = vpop.eup %2847 }
 0x417   : > { %1702 = vst.msk [vmem:[#allocation5] sm:$0xff] %vm1457_vm7, %v2848_v51  ;;  %1701 = vst.msk [vmem:[%s3518_s18] sm:$0xff] %vm1457_vm7, %v2848_v51 }
 0x41e   : > { %v1703_v52 = vld [vmem:[#allocation5] ss:$2 sm:$0xf]  ;;  %v1705_v53 = vld [vmem:[#allocation5 + $0x1] ss:$2 sm:$0xf] }
 0x41f   : > { %v1706_v54 = vmax.f32 %v1703_v52, %v1705_v53 }
 0x421   : > { %v1707_v55 = vadd.f32 1e-08, %v1706_v54 }
 0x423   : > { %1711 = vst.msk [vmem:[#allocation6 + $0x1] sm:$0xf] %vm1710_vm8, %v1707_v55  ;;  %2672 = vmatmul.mubr.msk.f32.vlgmr.msra.gmra.mxu0 %vm1457_vm7, %v1707_v55 }
 0x424   : > { %2682 = vmatpush3.msra.mxu0 %v1867_v56  ;;  %2685 = vmatprep.mubr.msk.f32.mxu0 %vm3154_vm5, %v3153_v0 }
 0x425   : > { %2683 = vmatprep.subr.mxu0 %v3153_v0 }
 0x426   : > { %2684 = vmatpush3.msra.mxu0 %v1866_v57 }
 0x427   : > { %2699 = vmatprep.subr.mxu0 %v3153_v0 }
 0x42a   : > { %v1712_v58 = vld [vmem:[#allocation6] sm:$0xf] }
 0x42b   : > { %v1864_v59 = vld [vmem:[#allocation6 + $0x2] sm:$0xf]  ;;  %2679 = vmatmul.mubr.msk.f32.vlgmr.msra.gmra.mxu1 %vm1457_vm7, %v1712_v58 }
 0x42c   : > { %2686 = vmatmul.mubr.msk.f32.vlgmr.msra.gmra.mxu0 %vm1457_vm7, %v1864_v59  ;;  %2696 = vmatprep.mubr.msk.f32.mxu1 %vm3154_vm5, %v3153_v0 }
 0x42d   : > { %2707 = vmatprep.mubr.msk.f32.mxu0 %vm3154_vm5, %v3153_v0  ;;  %2689 = vmatpush3.msra.mxu1 %v1969_v60 }
 0x42e   : > { %2690 = vmatprep.subr.mxu1 %v3153_v0  ;;  %2700 = vmatpush3.msra.mxu0 %v1964_v1 }
 0x42f   : > { %2691 = vmatpush3.msra.mxu1 %v1968_v61  ;;  %2701 = vmatprep.subr.mxu0 %v3153_v0 }
 0x430   : > { %2692 = vmatprep.subr.mxu1 %v3153_v0  ;;  %2702 = vmatpush3.msra.mxu0 %v1963_v2 }
 0x431   : > { %2693 = vmatpush3.msra.mxu1 %v1967_v62  ;;  %2703 = vmatprep.subr.mxu0 %v3153_v0 }
 0x432   : > { %2694 = vmatprep.subr.mxu1 %v3153_v0  ;;  %2704 = vmatpush3.msra.mxu0 %v1962_v3 }
 0x433   : > { %2695 = vmatpush3.msra.mxu1 %v1966_v63  ;;  %2705 = vmatprep.subr.mxu0 %v3153_v0 }
 0x434   : > { %2710 = vmatprep.subr.mxu1 %v3153_v0  ;;  %2706 = vmatpush3.msra.mxu0 %v1961_v4 }
 0x4e3   : > { %v1787_v5 = vpop.f32.mrf.mxu0 }
 0x4e5   : > { %v2673_v6 = vpop.f32.mrf.mxu0 }
 0x4eb   : > { %v1860_v8 = vpop.f32.mrf.mxu1 }
 0x4ec   : > { %v1937_v9 = vpop.f32.mrf.mxu0  ;;  %v1861_v10 = vadd.f32 %v1860_v8, %v1787_v5 }
 0x4ed   : > { %v2680_v12 = vpop.f32.mrf.mxu1 }
 0x4ee   : > { %v2687_v13 = vpop.f32.mrf.mxu0  ;;  %v1941_v14 = vadd.f32 %v1937_v9, %v1861_v10 }
 0x4f0   : > { %v1947_v16 = vmul.f32 %v1946_v11, %v1941_v14 }
 0x4f2   : > { %v1952_v17 = vadd.f32 %v1951_v15, %v1947_v16 }
 0x4f4   : > { %2849 = vtanh.f32 %v1952_v17 }
 0x501   : > { %v2850_v18 = vpop.eup %2849 }
 0x502   : > { %v1954_v20 = vadd.f32 1e-08, %v2850_v18 }
 0x504   : > { %1959 = vst.msk [vmem:[#allocation7 + $0x1] sm:$0xf] %vm1958_vm10, %v1954_v20  ;;  %2697 = vmatmul.mubr.msk.f32.vlgmr.msra.gmra.mxu1 %vm1970_vm11, %v1954_v20 }
 0x505   : > { %2711 = vmatpush3.msra.mxu1 %v2122_v22  ;;  %2718 = vmatprep.mubr.msk.f32.mxu1 %vm3154_vm5, %v3153_v0 }
 0x506   : > { %2712 = vmatprep.subr.mxu1 %v3153_v0 }
 0x507   : > { %2713 = vmatpush3.msra.mxu1 %v2121_v23 }
 0x508   : > { %2714 = vmatprep.subr.mxu1 %v3153_v0 }
 0x509   : > { %2715 = vmatpush3.msra.mxu1 %v2120_v24 }
 0x50a   : > { %2716 = vmatprep.subr.mxu1 %v3153_v0 }
 0x50b   : > { %2717 = vmatpush3.msra.mxu1 %v2119_v25  ;;  %v1960_v26 = vld [vmem:[#allocation7] sm:$0xf] }
 0x50c   : > { %v2117_v27 = vld [vmem:[#allocation7 + $0x2] sm:$0xf]  ;;  %2708 = vmatmul.mubr.msk.f32.vlgmr.msra.gmra.mxu0 %vm1970_vm11, %v1960_v26 }
 0x50d   : > { %2719 = vmatmul.mubr.msk.f32.vlgmr.msra.gmra.mxu1 %vm1970_vm11, %v2117_v27 }
 0x50e   : > { %3022 = shalt.err (!%p3019_p0)
}
 0x50f   : > { %s3023_s28 = scalar_lea.hbm %s2247_s3, 128  ;;  %s3027_s20 = scalar_lea.hbm %s3667_s14, 256 }
 0x510   : > { %p3024_p9 = scmp.ne.s32.totalorder %s2247_s3, %s3023_s28  ;;  %p3028_p5 = scmp.lt.s32.totalorder %s2247_s3, %s3667_s14 }
 0x511   : > { %p3029_p6 = scmp.lt.s32.totalorder %s3027_s20, %s3023_s28 }
 0x512   : > { %p3025_p1 = pnand %p3024_p9, %p3713_p2 }
 0x513   : > { %p3030_p10 = por %p3029_p6, %p3028_p5 }
 0x514   : > { %p3026_p12 = pneg %p3025_p1 }
 0x516   : > { %p3031_p3 = pnand %p3030_p10, %p3026_p12 }
 0x518   : > { %3034 = shalt.err (!%p3031_p3)
}
 0x519   : > { %2745 = dma.vmem_to_hbm [thread:$0]  (%p3713_p2), %s2250_s17, 128, %s2247_s3, %s2223_s16   ;;  %v2197_v29 = vld [vmem:[%s3665_s12] sm:$0x3] }
 0x51a   : > { %v2201_v33 = vrot.slane %v2197_v29, %v3415_v19  ;;  %v2206_v37 = vrot.slane %v2197_v29, %v3420_v21  ;;  %s2497_s3 = sshll.u32 %s3514_s30, 2  ;;  %s2227_s17 = sand.u32 1, %s3264_s25  }
 0x51b   : > { %s2538_s16 = sshll.u32 %s3264_s25, 6  ;;  %s618_s23 = scalar_lea.vmem [#allocation20], %s2497_s3 }
 0x51c   : > { %s2262_s27 = sshll.u32 %s618_s23, 4  ;;  %s3585_s21 = scalar_lea.hbm %s3668_s15, %s2538_s16  ;;  %s3587_s27 = int_to_ptr.vmem [resolvable:$true] %s2262_s27 }
 0x51d   : > { %s2498_s20 = sshll.u32 %s3514_s30, 1  ;;  %s3592_s24 = scalar_lea.sflag [#allocation21], %s2227_s17 }
 0x51e   : > { %s3035_s29 = scalar_lea.vmem %s3587_s27, 64  ;;  %s3156_s26 = smov [#allocation20]  }
 0x51f   : > { %p3036_p4 = scmp.ne.s32.totalorder %s3587_s27, %s3035_s29  ;;  %s3039_s19 = sshll.u32 %s3156_s26, 4  ;;  %s3040_s19 = int_to_ptr.vmem [resolvable:$false] %s3039_s19 }
 0x520   : > { %s3041_s3 = scalar_lea.vmem %s3040_s19, 128  ;;  %p3042_p13 = scmp.lt.s32.totalorder %s3587_s27, %s3040_s19 }
 0x521   : > { %p3037_p7 = pnand %p3036_p4, %p3713_p2  ;;  %p3043_p11 = scmp.lt.s32.totalorder %s3041_s3, %s3035_s29 }
 0x523   : > { %p3038_p8 = pneg %p3037_p7  ;;  %p3044_p0 = por %p3043_p11, %p3042_p13 }
 0x525   : > { %p3045_p9 = pnand %p3044_p0, %p3038_p8 }
 0x5c4   : > { %v2040_v0 = vpop.f32.mrf.mxu1 }
 0x5c6   : > { %v2698_v28 = vpop.f32.mrf.mxu1 }
 0x5cc   : > { %v2113_v30 = vpop.f32.mrf.mxu0 }
 0x5cd   : > { %v2192_v31 = vpop.f32.mrf.mxu1  ;;  %v2114_v32 = vadd.f32 %v2113_v30, %v2040_v0 }
 0x5ce   : > { %v2709_v34 = vpop.f32.mrf.mxu0 }
 0x5cf   : > { %v2720_v35 = vpop.f32.mrf.mxu1  ;;  %v2196_v36 = vadd.f32 %v2192_v31, %v2114_v32 }
 0x5d1   : > { %v2202_v38 = vmul.f32 %v2201_v33, %v2196_v36 }
 0x5d3   : > { %v2207_v39 = vadd.f32 %v2206_v37, %v2202_v38 }
 0x5d5   : > { %2851 = vtanh.f32 %v2207_v39 }
 0x5e2   : > { %v2852_v19 = vpop.eup %2851 }
 0x5e3   : > { %2210 = vst.msk [vmem:[#allocation7] sm:$0xf] %vm1958_vm10, %v2852_v19  ;;  %2209 = vst.msk [vmem:[%s618_s23] sm:$0xf] %vm1958_vm10, %v2852_v19 }
 0x5e4   : > { %3048 = shalt.err (!%p3045_p9)
}
 0x5e5   : > { %s3049_s17 = scalar_lea.hbm %s3585_s21, 64  ;;  %s3053_s28 = scalar_lea.hbm %s3668_s15, 128 }
 0x5e6   : > { %p3050_p1 = scmp.ne.s32.totalorder %s3585_s21, %s3049_s17  ;;  %p3054_p6 = scmp.lt.s32.totalorder %s3585_s21, %s3668_s15 }
 0x5e7   : > { %p3055_p10 = scmp.lt.s32.totalorder %s3053_s28, %s3049_s17 }
 0x5e8   : > { %p3051_p12 = pnand %p3050_p1, %p3713_p2 }
 0x5e9   : > { %p3056_p3 = por %p3055_p10, %p3054_p6 }
 0x5ea   : > { %p3052_p5 = pneg %p3051_p12 }
 0x5ec   : > { %p3057_p4 = pnand %p3056_p3, %p3052_p5 }
 0x5ee   : > { %3060 = shalt.err (!%p3057_p4)
}
 0x5ef   : > { %2746 = dma.vmem_to_hbm [thread:$0]  (%p3713_p2), %s3587_s27, 64, %s3585_s21, %s3592_s24   ;;  %vm2215_vm12 = vcmask 254976   ;;  %v2211_v21 = vld [vmem:[#allocation7] ss:$2 sm:$0x3] }
 0x5f0   : > { %s2539_s29 = sshll.u32 %s3264_s25, 5  ;;  %s625_s19 = scalar_lea.vmem [#allocation22], %s2498_s20  ;;  %v2213_v40 = vld [vmem:[#allocation7 + $0x1] ss:$2 sm:$0x3] }
 0x5f1   : > { %s2275_s3 = sshll.u32 %s625_s19, 4  ;;  %v2214_v41 = vmax.f32 %v2211_v21, %v2213_v40  ;;  %s3714_s23 = sld [smem:[#allocation37_spill]]  ;;  %s2276_s3 = int_to_ptr.vmem [resolvable:$true] %s2275_s3 }
 0x5f2   : > { %s3061_s26 = scalar_lea.vmem %s2276_s3, 32  ;;  %s3157_s27 = smov [#allocation22]  }
 0x5f3   : > { %2216 = vst.msk [vmem:[%s625_s19] sm:$0x3] %vm2215_vm12, %v2214_v41  ;;  %p3062_p7 = scmp.ne.s32.totalorder %s2276_s3, %s3061_s26  ;;  %s3065_s25 = sshll.u32 %s3157_s27, 4  ;;  %s3066_s25 = int_to_ptr.vmem [resolvable:$false] %s3065_s25 }
 0x5f4   : > { %s3067_s30 = scalar_lea.vmem %s3066_s25, 64  ;;  %p3068_p11 = scmp.lt.s32.totalorder %s2276_s3, %s3066_s25 }
 0x5f5   : > { %p3063_p8 = pnand %p3062_p7, %p3713_p2  ;;  %p3069_p0 = scmp.lt.s32.totalorder %s3067_s30, %s3061_s26 }
 0x5f7   : > { %s3715_s28 = smov %s3714_s23  ;;  %s2273_s18 = scalar_lea.hbm %s3714_s23, %s2539_s29 }
 0x5f8   : > { %p3064_p13 = pneg %p3063_p8  ;;  %p3070_p9 = por %p3069_p0, %p3068_p11 }
 0x5fa   : > { %p3071_p1 = pnand %p3070_p9, %p3064_p13 }
 0x5fc   : > { %3074 = shalt.err (!%p3071_p1)
}
 0x5fd   : > { %s3075_s21 = scalar_lea.hbm %s2273_s18, 32  ;;  %s3079_s19 = scalar_lea.hbm %s3715_s28, 64 }
 0x5fe   : > { %p3076_p12 = scmp.ne.s32.totalorder %s2273_s18, %s3075_s21  ;;  %p3080_p10 = scmp.lt.s32.totalorder %s2273_s18, %s3715_s28 }
 0x5ff   : > { %p3081_p3 = scmp.lt.s32.totalorder %s3079_s19, %s3075_s21 }
 0x600   : > { %p3077_p5 = pnand %p3076_p12, %p3713_p2 }
 0x601   : > { %p3082_p4 = por %p3081_p3, %p3080_p10 }
 0x602   : > { %p3078_p6 = pneg %p3077_p5 }
 0x604   : > { %p3083_p7 = pnand %p3082_p4, %p3078_p6 }
 0x606   : > { %3086 = shalt.err (!%p3083_p7)
}
 0x607   : > { %2747 = dma.vmem_to_hbm [thread:$0]  (%p3713_p2), %s2276_s3, 32, %s2273_s18, %s3592_s24  }
 0x608 PF: > { %s3716_s23 = sld [smem:[#allocation31_spill]] }
 0x609   : > { %s3717_s26 = sld [smem:[#allocation29_spill]] }
 0x60a   : > { %s3718_s27 = sld [smem:[#allocation34_spill]] }
 0x60e   : > { %p2792_p8 = scmp.ge.s32.totalorder %s3716_s23, 2 }
 0x60f   : > { %s2295_s25 = sand.u32 1, %s3717_s26  }
 0x610   : > { %p3719_p13 = scmp.ne.s32.totalorder %s3718_s27, 0  ;;  %s2296_s30 = scalar_lea.sflag [#allocation10], %s2295_s25 }
 0x612   : > { %p2771_p11 = pnand %p2792_p8, %p3719_p13 }
 0x614   : > { %p2772_p0 = pneg %p2771_p11 }
 0x616   : > { %3120 = dma.done.wait (%p2772_p0), %s2296_s30, 128  }
 0x617   : > { %3122 = vsyncadd (%p2772_p0), %s2296_s30, 4294967168  ;;  %s3720_s21 = sadd.s32 4294967294, %s3716_s23  }
 0x618   : > { %s2304_s20 = sand.u32 1, %s3720_s21  }
 0x619   : > { %s2305_s29 = scalar_lea.sflag [#allocation21], %s2304_s20 }
 0x61a   : > { %3124 = dma.done.wait (%p2772_p0), %s2305_s29, 96  }
 0x61b   : > { %3126 = vsyncadd (%p2772_p0), %s2305_s29, 4294967200  ;;  %s3721_s24 = sld [smem:[#allocation32_spill]]  ;;  %s3724_s21 = smov %s3133_s22 }
 0x61c   : > { %s3722_s0 = sld [smem:[#allocation30_spill]] }
 0x61d   : > { %s3723_s23 = sld [smem:[#allocation33_spill]] }
 0x621   : > { %p34_p2 = scmp.ge.s32.totalorder %s3721_s24, 4  }
 0x622   : > { %s3725_s22 = smov %s3722_s0 }
 0x623   :  { %36 = sbr.rel (!%p34_p2) target bundleno = 13 (0xd), region = 191 }
 0x628   :  { %2319 = vsyncpa [#allocation9], 1 }
 0x629   :  { %2321 = vsyncpa [#allocation9 + $0x1], 1 }
 0x62a   :  { %2322 = vsyncpa [#allocation12], 1 }
 0x62b   :  { %2323 = vsyncpa [#allocation15], 1 }
 0x62c   :  { %2324 = vsyncpa [#allocation18], 1 }
 0x62d   :  { %2325 = vsyncpa [#allocation10], 1 }
 0x62e   :  { %2327 = vsyncpa [#allocation10 + $0x1], 1 }
 0x62f   :  { %2328 = vsyncpa [#allocation21], 1 }
 0x630   :  { %2330 = vsyncpa [#allocation21 + $0x1], 1 }

</bundles_post_ra>
